<compile_context>
chip_gen: v5e
topology: v5e:2x2
jax: 0.10.0
libtpu: 0.0.40
codegen_flags: <defaults>
</compile_context>

<pallas_src>
import jax
import jax.numpy as jnp
from jax.experimental import pallas as pl
from jax.experimental.pallas import tpu as pltpu

EPS = 1e-5      # nn.BatchNorm2d default eps
LANE = 128      # lane-dense padding target for K and Cout


def _round_up(x, m):
    return ((x + m - 1) // m) * m


# ----------------------------------------------------------------------------
# Per-chip VMEM budget (cached): ~48 MiB scoped limit on v7x (64 MiB per TC),
# ~96 MiB on v5e/v6e (128 MiB physical).  Falls back to the v7x-safe value.
# ----------------------------------------------------------------------------
_VMEM_CAPS = None


def _vmem_caps():
    global _VMEM_CAPS
    if _VMEM_CAPS is None:
        try:
            cap = int(pltpu.get_tpu_info().vmem_capacity_bytes)
        except Exception:
            cap = 64 << 20                       # conservative: v7x per-TC VMEM
        limit = min(cap * 3 // 4, 96 << 20)      # scoped-VMEM limit we request
        budget = limit * 2 // 3                  # target working set (headroom)
        _VMEM_CAPS = (int(limit), int(budget))
    return _VMEM_CAPS


def _choose_tm(M, K_pad, C_pad, has_residual):
    """Largest M tile whose double-buffered working set fits the VMEM budget."""
    _, budget = _vmem_caps()
    bf2 = 2  # bf16 bytes
    tm = 16
    for cand in (2048, 1024, 512, 256, 128, 64, 32, 16):
        pass1 = (2 * cand * K_pad * bf2          # P tile, double buffered
                 + 2 * cand * C_pad * bf2        # bf16 y writeback tile
                 + 2 * K_pad * C_pad * bf2       # resident W (count 2 buffers)
                 + 4 * 8 * C_pad * 4)            # sum/sq accumulator blocks
        pass2 = (2 * cand * C_pad * bf2 * (1 + (1 if has_residual else 0))
                 + 2 * cand * C_pad * 4)         # f32 output worst case
        if max(pass1, pass2) <= budget:
            tm = cand
            break
    return max(16, min(tm, _round_up(M, 16)))    # multiple of 16 (bf16 sublane pack)


# ----------------------------------------------------------------------------
# Pallas kernels
# ----------------------------------------------------------------------------
def _stats_kernel(p_ref, w_ref, y_ref, sum_ref, sq_ref):
    """Pass 1: y = P @ W (MXU, bf16 -> f32 accum); write y back once as bf16
    and accumulate per-channel sum / sum-of-squares into this core's resident
    (8, C) accumulator block (full-vreg stores; every row carries the total)."""
    @pl.when(pl.program_id(1) == 0)
    def _():
        sum_ref[...] = jnp.zeros_like(sum_ref)
        sq_ref[...] = jnp.zeros_like(sq_ref)

    y = jnp.dot(p_ref[...], w_ref[...], preferred_element_type=jnp.float32)
    y_ref[...] = y.astype(y_ref.dtype)
    sum_ref[...] += jnp.sum(y, axis=0, keepdims=True)       # broadcast to 8 rows
    sq_ref[...] += jnp.sum(y * y, axis=0, keepdims=True)


def _make_apply_kernel(add_residual: bool, apply_relu: bool):
    """Pass 2: out = y*scale + bias (+residual) (+ReLU).  Pure VPU epilogue,
    no matmul recompute -- y comes from the bf16 round trip of pass 1."""
    def kernel(y_ref, scale_ref, bias_ref, *rest):
        if add_residual:
            res_ref, o_ref = rest
        else:
            (o_ref,) = rest
        out = y_ref[...].astype(jnp.float32) * scale_ref[...] + bias_ref[...]
        if add_residual:
            out = out + res_ref[...].astype(jnp.float32)
        if apply_relu:
            out = jnp.maximum(out, 0.0)
        o_ref[...] = out.astype(o_ref.dtype)
    return kernel


# ----------------------------------------------------------------------------
# Fused conv-as-GEMM + training-mode BatchNorm + residual + ReLU wrapper
# ----------------------------------------------------------------------------
def conv_bn(patches, w_mat, gamma, beta, *, residual=None, relu=False,
            out_dtype=jnp.bfloat16):
    """patches: (M, K) im2col activations (pass bf16 to avoid a cast copy).
    w_mat: (K, Cout).  residual: optional (>=M, Cout..C_pad) tensor added
    before the ReLU.  Returns the padded (M_pad, C_pad) result (slice
    [:M, :Cout] for the true output); kept padded so downstream consumers
    avoid re-pad round trips."""
    M, K = patches.shape
    Cout = w_mat.shape[1]
    K_pad = _round_up(K, LANE)
    C_pad = _round_up(Cout, LANE)
    vmem_limit, _ = _vmem_caps()

    tm = _choose_tm(M, K_pad, C_pad, residual is not None)
    M_pad = _round_up(M, tm)
    n_tiles = M_pad // tm

    # bf16 MXU operands, lane-dense.  The pads below are no-ops when the
    # caller already supplies aligned bf16 data (conv2 path).  Zero-padded
    # rows / channels contribute zeros to all statistics (divide by true M).
    p_bf = patches if patches.dtype == jnp.bfloat16 else patches.astype(jnp.bfloat16)
    if (M_pad, K_pad) != (M, K):
        p_bf = jnp.pad(p_bf, ((0, M_pad - M), (0, K_pad - K)))
    w_bf = w_mat if w_mat.dtype == jnp.bfloat16 else w_mat.astype(jnp.bfloat16)
    if (K_pad, C_pad) != (K, Cout):
        w_bf = jnp.pad(w_bf, ((0, K_pad - K), (0, C_pad - Cout)))

    # Split the M tiles into 2 slabs -> leading 'parallel' grid axis so pass 1
    # (stats) also uses both TensorCores on megacore parts.  Harmless (pure
    # sequential loop) on single-core chips.
    n_split = 2 if (n_tiles % 2 == 0 and n_tiles >= 2) else 1
    tiles_per = n_tiles // n_split

    p_spec = pl.BlockSpec((tm, K_pad), lambda c, i: (c * tiles_per + i, 0))
    w_spec = pl.BlockSpec((K_pad, C_pad), lambda c, i: (0, 0))        # resident
    y_spec = pl.BlockSpec((tm, C_pad), lambda c, i: (c * tiles_per + i, 0))
    acc_spec = pl.BlockSpec((8, C_pad), lambda c, i: (c, 0))          # per-core

    # ---- pass 1: MXU matmul + bf16 y writeback + batch statistics ----------
    y_bf, s_sum, s_sq = pl.pallas_call(
        _stats_kernel,
        grid=(n_split, tiles_per),
        in_specs=[p_spec, w_spec],
        out_specs=(y_spec, acc_spec, acc_spec),
        out_shape=(jax.ShapeDtypeStruct((M_pad, C_pad), jnp.bfloat16),
                   jax.ShapeDtypeStruct((8 * n_split, C_pad), jnp.float32),
                   jax.ShapeDtypeStruct((8 * n_split, C_pad), jnp.float32)),
        compiler_params=pltpu.CompilerParams(
            dimension_semantics=("parallel", "arbitrary"),
            vmem_limit_bytes=vmem_limit),
    )(p_bf, w_bf)

    # Fold BN into per-channel scale / bias (tiny, f32, XLA side).  Every row
    # of a core's (8, C) accumulator holds the full per-core total -> row 0.
    s_sum = jnp.sum(s_sum[0::8], axis=0, keepdims=True)
    s_sq = jnp.sum(s_sq[0::8], axis=0, keepdims=True)
    inv_m = 1.0 / M                               # true M, not padded M
    mean = s_sum * inv_m
    # TODO(synk): E[y^2]-mean^2 can cancel for large-mean activations; a
    # shifted / Welford-style accumulation would be numerically sturdier.
    var = jnp.maximum(s_sq * inv_m - mean * mean, 0.0)
    gamma_p = jnp.pad(gamma.astype(jnp.float32)[None, :], ((0, 0), (0, C_pad - Cout)))
    beta_p = jnp.pad(beta.astype(jnp.float32)[None, :], ((0, 0), (0, C_pad - Cout)))
    scale = gamma_p * jax.lax.rsqrt(var + EPS)
    bias = beta_p - mean * scale

    # ---- pass 2: affine epilogue (tiled over M, parallel across cores) -----
    row_spec = pl.BlockSpec((tm, C_pad), lambda i: (i, 0))
    vec_spec = pl.BlockSpec((1, C_pad), lambda i: (0, 0))
    args = [y_bf, scale, bias]
    in_specs = [row_spec, vec_spec, vec_spec]
    if residual is not None:
        res = residual.astype(jnp.bfloat16)
        if res.shape[1] < C_pad:                       # no-op on the fused path
            res = jnp.pad(res, ((0, 0), (0, C_pad - res.shape[1])))
        if res.shape[0] < M_pad:
            res = jnp.pad(res, ((0, M_pad - res.shape[0]), (0, 0)))
        elif res.shape[0] > M_pad:
            res = res[:M_pad]
        args.append(res)
        in_specs.append(row_spec)

    out = pl.pallas_call(
        _make_apply_kernel(residual is not None, relu),
        grid=(n_tiles,),
        in_specs=in_specs,
        out_specs=row_spec,
        out_shape=jax.ShapeDtypeStruct((M_pad, C_pad), out_dtype),
        compiler_params=pltpu.CompilerParams(
            dimension_semantics=("parallel",),
            vmem_limit_bytes=vmem_limit),
    )(*args)
    return out


# ----------------------------------------------------------------------------
# Glue: im2col, weight layout, parameter init, BasicBlock forward
# ----------------------------------------------------------------------------
def _im2col(x_nhwc, k, stride, pad):
    """NHWC -> (N*Ho*Wo, k*k*C) patches, (kh, kw) major / channel minor.
    TODO(synk): implicit GEMM (shifted taps in VMEM) would avoid materializing
    this 9x-sized tensor in HBM entirely."""
    N, H, W, C = x_nhwc.shape
    Ho = (H + 2 * pad - k) // stride + 1
    Wo = (W + 2 * pad - k) // stride + 1
    xp = jnp.pad(x_nhwc, ((0, 0), (pad, pad), (pad, pad), (0, 0)))
    cols = []
    for kh in range(k):
        for kw in range(k):
            cols.append(xp[:, kh:kh + stride * (Ho - 1) + 1:stride,
                              kw:kw + stride * (Wo - 1) + 1:stride, :])
    p = jnp.stack(cols, axis=3)                 # (N, Ho, Wo, k*k, C)
    return p.reshape(N * Ho * Wo, k * k * C), Ho, Wo


def _weight_to_gemm(w_oihw, c_in_pad=None):
    """(Cout, Cin, KH, KW) -> (KH*KW*Cin[_pad], Cout) bf16, matching _im2col."""
    co, ci, kh, kw = w_oihw.shape
    w = jnp.transpose(w_oihw, (2, 3, 1, 0))     # (KH, KW, Cin, Cout)
    if c_in_pad is not None and c_in_pad != ci:
        w = jnp.pad(w, ((0, 0), (0, 0), (0, c_in_pad - ci), (0, 0)))
        ci = c_in_pad
    return w.reshape(kh * kw * ci, co).astype(jnp.bfloat16)


def init_basic_block_params(key, in_planes, planes, stride):
    """Shapes follow BasicBlock.__init__; kaiming_uniform(a=sqrt(5)) == U(+-1/sqrt(fan_in))."""
    ks = jax.random.split(key, 9)

    def kaiming(k_, shape):
        fan_in = shape[1] * shape[2] * shape[3]
        bound = 1.0 / (fan_in ** 0.5)
        return jax.random.uniform(k_, shape, jnp.float32, -bound, bound)

    p = {
        "w1": kaiming(ks[0], (planes, in_planes, 3, 3)),
        "g1": jax.random.uniform(ks[1], (planes,), jnp.float32, 0.5, 1.5),
        "b1": jax.random.uniform(ks[2], (planes,), jnp.float32, -0.1, 0.1),
        "w2": kaiming(ks[3], (planes, planes, 3, 3)),
        "g2": jax.random.uniform(ks[4], (planes,), jnp.float32, 0.5, 1.5),
        "b2": jax.random.uniform(ks[5], (planes,), jnp.float32, -0.1, 0.1),
    }
    if stride != 1 or in_planes != planes:       # expansion == 1
        p["w3"] = kaiming(ks[6], (planes, in_planes, 1, 1))
        p["g3"] = jax.random.uniform(ks[7], (planes,), jnp.float32, 0.5, 1.5)
        p["b3"] = jax.random.uniform(ks[8], (planes,), jnp.float32, -0.1, 0.1)
    return p


def basic_block_forward(x_nchw, params, stride):
    """out = relu(bn2(conv2(relu(bn1(conv1(x))))) + shortcut(x))  (training-mode BN)."""
    x = jnp.transpose(x_nchw, (0, 2, 3, 1))            # NHWC
    N, H, W, Cin = x.shape
    planes = params["w1"].shape[0]
    C_pad = _round_up(planes, LANE)
    x_bf = x.astype(jnp.bfloat16)                      # bf16 before im2col

    # conv1 (3x3, stride, pad 1) + bn1 + relu  -- fused Pallas path
    p1, Ho, Wo = _im2col(x_bf, 3, stride, 1)           # (M, 9*Cin) bf16
    M = N * Ho * Wo
    y1 = conv_bn(p1, _weight_to_gemm(params["w1"]),
                 params["g1"], params["b1"], relu=True)        # (M_pad, C_pad) bf16
    # keep y1 channel-padded so conv2's im2col K (= 9*C_pad) is 128-aligned
    y1_img = y1[:M].reshape(N, Ho, Wo, C_pad)

    # shortcut branch -> padded (M, C_pad) bf16, fed directly as the residual
    if "w3" in params:       # conv3 (1x1, stride) + bn3  -- fused Pallas path
        ps = x_bf[:, ::stride, ::stride, :].reshape(M, Cin)
        sc = conv_bn(ps, _weight_to_gemm(params["w3"]),
                     params["g3"], params["b3"], relu=False)
    else:                    # identity
        sc = x_bf.reshape(M, Cin)
        if Cin < C_pad:
            sc = jnp.pad(sc, ((0, 0), (0, C_pad - Cin)))

    # conv2 (3x3, stride 1, pad 1) + bn2 + residual add + relu -- fused path
    p2, _, _ = _im2col(y1_img, 3, 1, 1)                # (M, 9*C_pad) bf16, K aligned
    out = conv_bn(p2, _weight_to_gemm(params["w2"], c_in_pad=C_pad),
                  params["g2"], params["b2"],
                  residual=sc, relu=True, out_dtype=jnp.float32)

    out = out[:M, :planes].reshape(N, Ho, Wo, planes)
    return jnp.transpose(out, (0, 3, 1, 2))            # back to NCHW


# ----------------------------------------------------------------------------
# Pure-JAX reference (sanity check)
# ----------------------------------------------------------------------------
def ref_forward(x_nchw, params, stride):
    x = jnp.transpose(x_nchw, (0, 2, 3, 1)).astype(jnp.float32)

    def conv(inp, w, s, pad):
        return jax.lax.conv_general_dilated(
            inp, jnp.transpose(w, (2, 3, 1, 0)),
            window_strides=(s, s), padding=[(pad, pad), (pad, pad)],
            dimension_numbers=("NHWC", "HWIO", "NHWC"),
            precision=jax.lax.Precision.HIGHEST)

    def bn(y, g, b):
        mean = y.mean(axis=(0, 1, 2), keepdims=True)
        var = ((y - mean) ** 2).mean(axis=(0, 1, 2), keepdims=True)
        return (y - mean) * jax.lax.rsqrt(var + EPS) * g + b

    y = jax.nn.relu(bn(conv(x, params["w1"], stride, 1), params["g1"], params["b1"]))
    y = bn(conv(y, params["w2"], 1, 1), params["g2"], params["b2"])
    if "w3" in params:
        sc = bn(conv(x, params["w3"], stride, 0), params["g3"], params["b3"])
    else:
        sc = x
    return jnp.transpose(jax.nn.relu(y + sc), (0, 3, 1, 2))


def _rel_err(a, b):
    return float(jnp.linalg.norm(a - b) / (jnp.linalg.norm(b) + 1e-8))


if __name__ == "__main__":
    key = jax.random.PRNGKey(0)
    kx, kp1, kp2 = jax.random.split(key, 3)

    # PyTorch-style NCHW input
    x = jax.random.normal(kx, (2, 4, 16, 16), jnp.float32)

    forward = jax.jit(basic_block_forward, static_argnames=("stride",))

    # Case 1: downsampling block (stride=2, channels 4 -> 8) -> conv3/bn3 path.
    params = init_basic_block_params(kp1, in_planes=4, planes=8, stride=2)
    out = jax.block_until_ready(forward(x, params, stride=2))
    ref = ref_forward(x, params, stride=2)
    assert out.shape == (2, 8, 8, 8), out.shape
    err1 = _rel_err(out, ref)
    assert err1 < 3e-2, err1   # bf16 matmul operands + bf16 y round trip

    # Case 2: identity shortcut (stride=1, in_planes == planes == 4).
    params2 = init_basic_block_params(kp2, in_planes=4, planes=4, stride=1)
    out2 = jax.block_until_ready(forward(x, params2, stride=1))
    ref2 = ref_forward(x, params2, stride=1)
    assert out2.shape == (2, 4, 16, 16), out2.shape
    err2 = _rel_err(out2, ref2)
    assert err2 < 3e-2, err2

    print("KERNEL_OK")
</pallas_src>

<mosaic_0001>
module attributes {stable_mosaic.version = 11 : i64} {
  func.func @_stats_kernel(%arg0: i32, %arg1: i32, %arg2: memref<128x128xbf16, #tpu.memory_space<vmem>>, %arg3: memref<128x128xbf16, #tpu.memory_space<vmem>>, %arg4: memref<128x128xbf16, #tpu.memory_space<vmem>>, %arg5: memref<8x128xf32, #tpu.memory_space<vmem>>, %arg6: memref<8x128xf32, #tpu.memory_space<vmem>>) attributes {dimension_semantics = [#tpu.dimension_semantics<parallel>, #tpu.dimension_semantics<arbitrary>], iteration_bounds = array<i64: 1, 1>, scalar_prefetch = 0 : i64, scratch_operands = 0 : i64, tpu.core_type = #tpu.core_type<tc>, window_params = [{transform_indices = @transform_0, window_bounds = array<i64: 128, 128>}, {pipeline_mode = #tpu.pipeline_mode<synchronous>, transform_indices = @transform_1, window_bounds = array<i64: 128, 128>}, {transform_indices = @transform_2, window_bounds = array<i64: 128, 128>}, {transform_indices = @transform_3, window_bounds = array<i64: 8, 128>}, {transform_indices = @transform_4, window_bounds = array<i64: 8, 128>}]} {
    %c0_i32 = arith.constant 0 : i32
    %0 = arith.cmpi eq, %arg1, %c0_i32 : i32
    %1 = arith.extui %0 : i1 to i32
    %c0_i32_0 = arith.constant 0 : i32
    %2 = arith.cmpi ne, %1, %c0_i32_0 : i32
    scf.if %2 {
      %cst_16 = arith.constant 0.000000e+00 : f32
      %21 = vector.broadcast %cst_16 : f32 to vector<8x128xf32>
      %c0_17 = arith.constant 0 : index
      %c0_18 = arith.constant 0 : index
      %22 = vector.load %arg5[%c0_17, %c0_18] : memref<8x128xf32, #tpu.memory_space<vmem>>, vector<8x128xf32>
      tpu.vector_store %arg5[%c0_17, %c0_18], %21 {strides = array<i32>} : memref<8x128xf32, #tpu.memory_space<vmem>>, vector<8x128xf32>,
      %cst_19 = arith.constant 0.000000e+00 : f32
      %23 = vector.broadcast %cst_19 : f32 to vector<8x128xf32>
      %c0_20 = arith.constant 0 : index
      %c0_21 = arith.constant 0 : index
      %24 = vector.load %arg6[%c0_20, %c0_21] : memref<8x128xf32, #tpu.memory_space<vmem>>, vector<8x128xf32>
      tpu.vector_store %arg6[%c0_20, %c0_21], %23 {strides = array<i32>} : memref<8x128xf32, #tpu.memory_space<vmem>>, vector<8x128xf32>,
    } else {
    }
    %c0 = arith.constant 0 : index
    %c0_1 = arith.constant 0 : index
    %3 = vector.load %arg2[%c0, %c0_1] : memref<128x128xbf16, #tpu.memory_space<vmem>>, vector<128x128xbf16>
    %c0_2 = arith.constant 0 : index
    %c0_3 = arith.constant 0 : index
    %4 = vector.load %arg3[%c0_2, %c0_3] : memref<128x128xbf16, #tpu.memory_space<vmem>>, vector<128x128xbf16>
    %cst = arith.constant dense<0.000000e+00> : vector<128x128xf32>
    %5 = tpu.matmul %3, %4, %cst {dimension_numbers = #tpu.dot_dimension_numbers<[1], [0], [0], [1], [0, 0, 1, 1], [], []>} : vector<128x128xbf16>, vector<128x128xbf16>, vector<128x128xf32> -> vector<128x128xf32>
    %6 = arith.truncf %5 : vector<128x128xf32> to vector<128x128xbf16>
    %c0_4 = arith.constant 0 : index
    %c0_5 = arith.constant 0 : index
    %7 = vector.load %arg4[%c0_4, %c0_5] : memref<128x128xbf16, #tpu.memory_space<vmem>>, vector<128x128xbf16>
    tpu.vector_store %arg4[%c0_4, %c0_5], %6 {strides = array<i32>} : memref<128x128xbf16, #tpu.memory_space<vmem>>, vector<128x128xbf16>,
    %c0_6 = arith.constant 0 : index
    %c0_7 = arith.constant 0 : index
    %8 = vector.load %arg5[%c0_6, %c0_7] : memref<8x128xf32, #tpu.memory_space<vmem>>, vector<8x128xf32>
    %cst_8 = arith.constant dense<0.000000e+00> : vector<128xf32>
    %9 = vector.multi_reduction <add>, %5, %cst_8 [0] : vector<128x128xf32> to vector<128xf32>
    %10 = vector.shape_cast %9 : vector<128xf32> to vector<1x128xf32>
    %11 = vector.broadcast %10 : vector<1x128xf32> to vector<8x128xf32>
    %12 = arith.addf %8, %11 : vector<8x128xf32>
    %c0_9 = arith.constant 0 : index
    %c0_10 = arith.constant 0 : index
    %13 = vector.load %arg5[%c0_9, %c0_10] : memref<8x128xf32, #tpu.memory_space<vmem>>, vector<8x128xf32>
    tpu.vector_store %arg5[%c0_9, %c0_10], %12 {strides = array<i32>} : memref<8x128xf32, #tpu.memory_space<vmem>>, vector<8x128xf32>,
    %c0_11 = arith.constant 0 : index
    %c0_12 = arith.constant 0 : index
    %14 = vector.load %arg6[%c0_11, %c0_12] : memref<8x128xf32, #tpu.memory_space<vmem>>, vector<8x128xf32>
    %15 = arith.mulf %5, %5 : vector<128x128xf32>
    %cst_13 = arith.constant dense<0.000000e+00> : vector<128xf32>
    %16 = vector.multi_reduction <add>, %15, %cst_13 [0] : vector<128x128xf32> to vector<128xf32>
    %17 = vector.shape_cast %16 : vector<128xf32> to vector<1x128xf32>
    %18 = vector.broadcast %17 : vector<1x128xf32> to vector<8x128xf32>
    %19 = arith.addf %14, %18 : vector<8x128xf32>
    %c0_14 = arith.constant 0 : index
    %c0_15 = arith.constant 0 : index
    %20 = vector.load %arg6[%c0_14, %c0_15] : memref<8x128xf32, #tpu.memory_space<vmem>>, vector<8x128xf32>
    tpu.vector_store %arg6[%c0_14, %c0_15], %19 {strides = array<i32>} : memref<8x128xf32, #tpu.memory_space<vmem>>, vector<8x128xf32>,
    return
  }
  func.func @transform_0(%arg0: i32, %arg1: i32) -> (i32, i32) {
    %c1_i32 = arith.constant 1 : i32
    %0 = arith.muli %arg0, %c1_i32 : i32
    %1 = arith.addi %0, %arg1 : i32
    %c0_i32 = arith.constant 0 : i32
    %c0_i32_0 = arith.constant 0 : i32
    return %1, %c0_i32 : i32, i32
  }
  func.func @transform_1(%arg0: i32, %arg1: i32) -> (i32, i32) {
    %c0_i32 = arith.constant 0 : i32
    %c0_i32_0 = arith.constant 0 : i32
    %c0_i32_1 = arith.constant 0 : i32
    return %c0_i32, %c0_i32_0 : i32, i32
  }
  func.func @transform_2(%arg0: i32, %arg1: i32) -> (i32, i32) {
    %c1_i32 = arith.constant 1 : i32
    %0 = arith.muli %arg0, %c1_i32 : i32
    %1 = arith.addi %0, %arg1 : i32
    %c0_i32 = arith.constant 0 : i32
    %c0_i32_0 = arith.constant 0 : i32
    return %1, %c0_i32 : i32, i32
  }
  func.func @transform_3(%arg0: i32, %arg1: i32) -> (i32, i32) {
    %c0_i32 = arith.constant 0 : i32
    %c0_i32_0 = arith.constant 0 : i32
    return %arg0, %c0_i32 : i32, i32
  }
  func.func @transform_4(%arg0: i32, %arg1: i32) -> (i32, i32) {
    %c0_i32 = arith.constant 0 : i32
    %c0_i32_0 = arith.constant 0 : i32
    return %arg0, %c0_i32 : i32, i32
  }
}

module attributes {stable_mosaic.version = 11 : i64} {
  func.func @kernel(%arg0: i32, %arg1: memref<128x128xbf16, #tpu.memory_space<vmem>>, %arg2: memref<1x128xf32, #tpu.memory_space<vmem>>, %arg3: memref<1x128xf32, #tpu.memory_space<vmem>>, %arg4: memref<128x128xbf16, #tpu.memory_space<vmem>>) attributes {dimension_semantics = [#tpu.dimension_semantics<parallel>], iteration_bounds = array<i64: 1>, scalar_prefetch = 0 : i64, scratch_operands = 0 : i64, tpu.core_type = #tpu.core_type<tc>, window_params = [{transform_indices = @transform_0, window_bounds = array<i64: 128, 128>}, {pipeline_mode = #tpu.pipeline_mode<synchronous>, transform_indices = @transform_1, window_bounds = array<i64: 1, 128>}, {pipeline_mode = #tpu.pipeline_mode<synchronous>, transform_indices = @transform_2, window_bounds = array<i64: 1, 128>}, {transform_indices = @transform_3, window_bounds = array<i64: 128, 128>}]} {
    %c0 = arith.constant 0 : index
    %c0_0 = arith.constant 0 : index
    %0 = vector.load %arg1[%c0, %c0_0] : memref<128x128xbf16, #tpu.memory_space<vmem>>, vector<128x128xbf16>
    %1 = arith.extf %0 : vector<128x128xbf16> to vector<128x128xf32>
    %c0_1 = arith.constant 0 : index
    %c0_2 = arith.constant 0 : index
    %2 = vector.load %arg2[%c0_1, %c0_2] : memref<1x128xf32, #tpu.memory_space<vmem>>, vector<1x128xf32>
    %3 = vector.broadcast %2 : vector<1x128xf32> to vector<128x128xf32>
    %4 = arith.mulf %1, %3 : vector<128x128xf32>
    %c0_3 = arith.constant 0 : index
    %c0_4 = arith.constant 0 : index
    %5 = vector.load %arg3[%c0_3, %c0_4] : memref<1x128xf32, #tpu.memory_space<vmem>>, vector<1x128xf32>
    %6 = vector.broadcast %5 : vector<1x128xf32> to vector<128x128xf32>
    %7 = arith.addf %4, %6 : vector<128x128xf32>
    %cst = arith.constant 0.000000e+00 : f32
    %8 = vector.broadcast %cst : f32 to vector<128x128xf32>
    %9 = arith.maximumf %7, %8 : vector<128x128xf32>
    %10 = arith.truncf %9 : vector<128x128xf32> to vector<128x128xbf16>
    %c0_5 = arith.constant 0 : index
    %c0_6 = arith.constant 0 : index
    %11 = vector.load %arg4[%c0_5, %c0_6] : memref<128x128xbf16, #tpu.memory_space<vmem>>, vector<128x128xbf16>
    tpu.vector_store %arg4[%c0_5, %c0_6], %10 {strides = array<i32>} : memref<128x128xbf16, #tpu.memory_space<vmem>>, vector<128x128xbf16>,
    return
  }
  func.func @transform_0(%arg0: i32) -> (i32, i32) {
    %c0_i32 = arith.constant 0 : i32
    %c0_i32_0 = arith.constant 0 : i32
    return %arg0, %c0_i32 : i32, i32
  }
  func.func @transform_1(%arg0: i32) -> (i32, i32) {
    %c0_i32 = arith.constant 0 : i32
    %c0_i32_0 = arith.constant 0 : i32
    %c0_i32_1 = arith.constant 0 : i32
    return %c0_i32, %c0_i32_0 : i32, i32
  }
  func.func @transform_2(%arg0: i32) -> (i32, i32) {
    %c0_i32 = arith.constant 0 : i32
    %c0_i32_0 = arith.constant 0 : i32
    %c0_i32_1 = arith.constant 0 : i32
    return %c0_i32, %c0_i32_0 : i32, i32
  }
  func.func @transform_3(%arg0: i32) -> (i32, i32) {
    %c0_i32 = arith.constant 0 : i32
    %c0_i32_0 = arith.constant 0 : i32
    return %arg0, %c0_i32 : i32, i32
  }
}

module attributes {stable_mosaic.version = 11 : i64} {
  func.func @_stats_kernel(%arg0: i32, %arg1: i32, %arg2: memref<128x1152xbf16, #tpu.memory_space<vmem>>, %arg3: memref<1152x128xbf16, #tpu.memory_space<vmem>>, %arg4: memref<128x128xbf16, #tpu.memory_space<vmem>>, %arg5: memref<8x128xf32, #tpu.memory_space<vmem>>, %arg6: memref<8x128xf32, #tpu.memory_space<vmem>>) attributes {dimension_semantics = [#tpu.dimension_semantics<parallel>, #tpu.dimension_semantics<arbitrary>], iteration_bounds = array<i64: 1, 1>, scalar_prefetch = 0 : i64, scratch_operands = 0 : i64, tpu.core_type = #tpu.core_type<tc>, window_params = [{transform_indices = @transform_0, window_bounds = array<i64: 128, 1152>}, {pipeline_mode = #tpu.pipeline_mode<synchronous>, transform_indices = @transform_1, window_bounds = array<i64: 1152, 128>}, {transform_indices = @transform_2, window_bounds = array<i64: 128, 128>}, {transform_indices = @transform_3, window_bounds = array<i64: 8, 128>}, {transform_indices = @transform_4, window_bounds = array<i64: 8, 128>}]} {
    %c0_i32 = arith.constant 0 : i32
    %0 = arith.cmpi eq, %arg1, %c0_i32 : i32
    %1 = arith.extui %0 : i1 to i32
    %c0_i32_0 = arith.constant 0 : i32
    %2 = arith.cmpi ne, %1, %c0_i32_0 : i32
    scf.if %2 {
      %cst_16 = arith.constant 0.000000e+00 : f32
      %21 = vector.broadcast %cst_16 : f32 to vector<8x128xf32>
      %c0_17 = arith.constant 0 : index
      %c0_18 = arith.constant 0 : index
      %22 = vector.load %arg5[%c0_17, %c0_18] : memref<8x128xf32, #tpu.memory_space<vmem>>, vector<8x128xf32>
      tpu.vector_store %arg5[%c0_17, %c0_18], %21 {strides = array<i32>} : memref<8x128xf32, #tpu.memory_space<vmem>>, vector<8x128xf32>,
      %cst_19 = arith.constant 0.000000e+00 : f32
      %23 = vector.broadcast %cst_19 : f32 to vector<8x128xf32>
      %c0_20 = arith.constant 0 : index
      %c0_21 = arith.constant 0 : index
      %24 = vector.load %arg6[%c0_20, %c0_21] : memref<8x128xf32, #tpu.memory_space<vmem>>, vector<8x128xf32>
      tpu.vector_store %arg6[%c0_20, %c0_21], %23 {strides = array<i32>} : memref<8x128xf32, #tpu.memory_space<vmem>>, vector<8x128xf32>,
    } else {
    }
    %c0 = arith.constant 0 : index
    %c0_1 = arith.constant 0 : index
    %3 = vector.load %arg2[%c0, %c0_1] : memref<128x1152xbf16, #tpu.memory_space<vmem>>, vector<128x1152xbf16>
    %c0_2 = arith.constant 0 : index
    %c0_3 = arith.constant 0 : index
    %4 = vector.load %arg3[%c0_2, %c0_3] : memref<1152x128xbf16, #tpu.memory_space<vmem>>, vector<1152x128xbf16>
    %cst = arith.constant dense<0.000000e+00> : vector<128x128xf32>
    %5 = tpu.matmul %3, %4, %cst {dimension_numbers = #tpu.dot_dimension_numbers<[1], [0], [0], [1], [0, 0, 1, 1], [], []>} : vector<128x1152xbf16>, vector<1152x128xbf16>, vector<128x128xf32> -> vector<128x128xf32>
    %6 = arith.truncf %5 : vector<128x128xf32> to vector<128x128xbf16>
    %c0_4 = arith.constant 0 : index
    %c0_5 = arith.constant 0 : index
    %7 = vector.load %arg4[%c0_4, %c0_5] : memref<128x128xbf16, #tpu.memory_space<vmem>>, vector<128x128xbf16>
    tpu.vector_store %arg4[%c0_4, %c0_5], %6 {strides = array<i32>} : memref<128x128xbf16, #tpu.memory_space<vmem>>, vector<128x128xbf16>,
    %c0_6 = arith.constant 0 : index
    %c0_7 = arith.constant 0 : index
    %8 = vector.load %arg5[%c0_6, %c0_7] : memref<8x128xf32, #tpu.memory_space<vmem>>, vector<8x128xf32>
    %cst_8 = arith.constant dense<0.000000e+00> : vector<128xf32>
    %9 = vector.multi_reduction <add>, %5, %cst_8 [0] : vector<128x128xf32> to vector<128xf32>
    %10 = vector.shape_cast %9 : vector<128xf32> to vector<1x128xf32>
    %11 = vector.broadcast %10 : vector<1x128xf32> to vector<8x128xf32>
    %12 = arith.addf %8, %11 : vector<8x128xf32>
    %c0_9 = arith.constant 0 : index
    %c0_10 = arith.constant 0 : index
    %13 = vector.load %arg5[%c0_9, %c0_10] : memref<8x128xf32, #tpu.memory_space<vmem>>, vector<8x128xf32>
    tpu.vector_store %arg5[%c0_9, %c0_10], %12 {strides = array<i32>} : memref<8x128xf32, #tpu.memory_space<vmem>>, vector<8x128xf32>,
    %c0_11 = arith.constant 0 : index
    %c0_12 = arith.constant 0 : index
    %14 = vector.load %arg6[%c0_11, %c0_12] : memref<8x128xf32, #tpu.memory_space<vmem>>, vector<8x128xf32>
    %15 = arith.mulf %5, %5 : vector<128x128xf32>
    %cst_13 = arith.constant dense<0.000000e+00> : vector<128xf32>
    %16 = vector.multi_reduction <add>, %15, %cst_13 [0] : vector<128x128xf32> to vector<128xf32>
    %17 = vector.shape_cast %16 : vector<128xf32> to vector<1x128xf32>
    %18 = vector.broadcast %17 : vector<1x128xf32> to vector<8x128xf32>
    %19 = arith.addf %14, %18 : vector<8x128xf32>
    %c0_14 = arith.constant 0 : index
    %c0_15 = arith.constant 0 : index
    %20 = vector.load %arg6[%c0_14, %c0_15] : memref<8x128xf32, #tpu.memory_space<vmem>>, vector<8x128xf32>
    tpu.vector_store %arg6[%c0_14, %c0_15], %19 {strides = array<i32>} : memref<8x128xf32, #tpu.memory_space<vmem>>, vector<8x128xf32>,
    return
  }
  func.func @transform_0(%arg0: i32, %arg1: i32) -> (i32, i32) {
    %c1_i32 = arith.constant 1 : i32
    %0 = arith.muli %arg0, %c1_i32 : i32
    %1 = arith.addi %0, %arg1 : i32
    %c0_i32 = arith.constant 0 : i32
    %c0_i32_0 = arith.constant 0 : i32
    return %1, %c0_i32 : i32, i32
  }
  func.func @transform_1(%arg0: i32, %arg1: i32) -> (i32, i32) {
    %c0_i32 = arith.constant 0 : i32
    %c0_i32_0 = arith.constant 0 : i32
    %c0_i32_1 = arith.constant 0 : i32
    return %c0_i32, %c0_i32_0 : i32, i32
  }
  func.func @transform_2(%arg0: i32, %arg1: i32) -> (i32, i32) {
    %c1_i32 = arith.constant 1 : i32
    %0 = arith.muli %arg0, %c1_i32 : i32
    %1 = arith.addi %0, %arg1 : i32
    %c0_i32 = arith.constant 0 : i32
    %c0_i32_0 = arith.constant 0 : i32
    return %1, %c0_i32 : i32, i32
  }
  func.func @transform_3(%arg0: i32, %arg1: i32) -> (i32, i32) {
    %c0_i32 = arith.constant 0 : i32
    %c0_i32_0 = arith.constant 0 : i32
    return %arg0, %c0_i32 : i32, i32
  }
  func.func @transform_4(%arg0: i32, %arg1: i32) -> (i32, i32) {
    %c0_i32 = arith.constant 0 : i32
    %c0_i32_0 = arith.constant 0 : i32
    return %arg0, %c0_i32 : i32, i32
  }
}

module attributes {stable_mosaic.version = 11 : i64} {
  func.func @kernel(%arg0: i32, %arg1: memref<128x128xbf16, #tpu.memory_space<vmem>>, %arg2: memref<1x128xf32, #tpu.memory_space<vmem>>, %arg3: memref<1x128xf32, #tpu.memory_space<vmem>>, %arg4: memref<128x128xbf16, #tpu.memory_space<vmem>>, %arg5: memref<128x128xf32, #tpu.memory_space<vmem>>) attributes {dimension_semantics = [#tpu.dimension_semantics<parallel>], iteration_bounds = array<i64: 1>, scalar_prefetch = 0 : i64, scratch_operands = 0 : i64, tpu.core_type = #tpu.core_type<tc>, window_params = [{transform_indices = @transform_0, window_bounds = array<i64: 128, 128>}, {pipeline_mode = #tpu.pipeline_mode<synchronous>, transform_indices = @transform_1, window_bounds = array<i64: 1, 128>}, {pipeline_mode = #tpu.pipeline_mode<synchronous>, transform_indices = @transform_2, window_bounds = array<i64: 1, 128>}, {transform_indices = @transform_3, window_bounds = array<i64: 128, 128>}, {transform_indices = @transform_4, window_bounds = array<i64: 128, 128>}]} {
    %c0 = arith.constant 0 : index
    %c0_0 = arith.constant 0 : index
    %0 = vector.load %arg1[%c0, %c0_0] : memref<128x128xbf16, #tpu.memory_space<vmem>>, vector<128x128xbf16>
    %1 = arith.extf %0 : vector<128x128xbf16> to vector<128x128xf32>
    %c0_1 = arith.constant 0 : index
    %c0_2 = arith.constant 0 : index
    %2 = vector.load %arg2[%c0_1, %c0_2] : memref<1x128xf32, #tpu.memory_space<vmem>>, vector<1x128xf32>
    %3 = vector.broadcast %2 : vector<1x128xf32> to vector<128x128xf32>
    %4 = arith.mulf %1, %3 : vector<128x128xf32>
    %c0_3 = arith.constant 0 : index
    %c0_4 = arith.constant 0 : index
    %5 = vector.load %arg3[%c0_3, %c0_4] : memref<1x128xf32, #tpu.memory_space<vmem>>, vector<1x128xf32>
    %6 = vector.broadcast %5 : vector<1x128xf32> to vector<128x128xf32>
    %7 = arith.addf %4, %6 : vector<128x128xf32>
    %c0_5 = arith.constant 0 : index
    %c0_6 = arith.constant 0 : index
    %8 = vector.load %arg4[%c0_5, %c0_6] : memref<128x128xbf16, #tpu.memory_space<vmem>>, vector<128x128xbf16>
    %9 = arith.extf %8 : vector<128x128xbf16> to vector<128x128xf32>
    %10 = arith.addf %7, %9 : vector<128x128xf32>
    %cst = arith.constant 0.000000e+00 : f32
    %11 = vector.broadcast %cst : f32 to vector<128x128xf32>
    %12 = arith.maximumf %10, %11 : vector<128x128xf32>
    %c0_7 = arith.constant 0 : index
    %c0_8 = arith.constant 0 : index
    %13 = vector.load %arg5[%c0_7, %c0_8] : memref<128x128xf32, #tpu.memory_space<vmem>>, vector<128x128xf32>
    tpu.vector_store %arg5[%c0_7, %c0_8], %12 {strides = array<i32>} : memref<128x128xf32, #tpu.memory_space<vmem>>, vector<128x128xf32>,
    return
  }
  func.func @transform_0(%arg0: i32) -> (i32, i32) {
    %c0_i32 = arith.constant 0 : i32
    %c0_i32_0 = arith.constant 0 : i32
    return %arg0, %c0_i32 : i32, i32
  }
  func.func @transform_1(%arg0: i32) -> (i32, i32) {
    %c0_i32 = arith.constant 0 : i32
    %c0_i32_0 = arith.constant 0 : i32
    %c0_i32_1 = arith.constant 0 : i32
    return %c0_i32, %c0_i32_0 : i32, i32
  }
  func.func @transform_2(%arg0: i32) -> (i32, i32) {
    %c0_i32 = arith.constant 0 : i32
    %c0_i32_0 = arith.constant 0 : i32
    %c0_i32_1 = arith.constant 0 : i32
    return %c0_i32, %c0_i32_0 : i32, i32
  }
  func.func @transform_3(%arg0: i32) -> (i32, i32) {
    %c0_i32 = arith.constant 0 : i32
    %c0_i32_0 = arith.constant 0 : i32
    return %arg0, %c0_i32 : i32, i32
  }
  func.func @transform_4(%arg0: i32) -> (i32, i32) {
    %c0_i32 = arith.constant 0 : i32
    %c0_i32_0 = arith.constant 0 : i32
    return %arg0, %c0_i32 : i32, i32
  }
}

module attributes {stable_mosaic.version = 11 : i64} {
  func.func @kernel(%arg0: i32, %arg1: memref<128x128xbf16, #tpu.memory_space<vmem>>, %arg2: memref<1x128xf32, #tpu.memory_space<vmem>>, %arg3: memref<1x128xf32, #tpu.memory_space<vmem>>, %arg4: memref<128x128xbf16, #tpu.memory_space<vmem>>) attributes {dimension_semantics = [#tpu.dimension_semantics<parallel>], iteration_bounds = array<i64: 1>, scalar_prefetch = 0 : i64, scratch_operands = 0 : i64, tpu.core_type = #tpu.core_type<tc>, window_params = [{transform_indices = @transform_0, window_bounds = array<i64: 128, 128>}, {pipeline_mode = #tpu.pipeline_mode<synchronous>, transform_indices = @transform_1, window_bounds = array<i64: 1, 128>}, {pipeline_mode = #tpu.pipeline_mode<synchronous>, transform_indices = @transform_2, window_bounds = array<i64: 1, 128>}, {transform_indices = @transform_3, window_bounds = array<i64: 128, 128>}]} {
    %c0 = arith.constant 0 : index
    %c0_0 = arith.constant 0 : index
    %0 = vector.load %arg1[%c0, %c0_0] : memref<128x128xbf16, #tpu.memory_space<vmem>>, vector<128x128xbf16>
    %1 = arith.extf %0 : vector<128x128xbf16> to vector<128x128xf32>
    %c0_1 = arith.constant 0 : index
    %c0_2 = arith.constant 0 : index
    %2 = vector.load %arg2[%c0_1, %c0_2] : memref<1x128xf32, #tpu.memory_space<vmem>>, vector<1x128xf32>
    %3 = vector.broadcast %2 : vector<1x128xf32> to vector<128x128xf32>
    %4 = arith.mulf %1, %3 : vector<128x128xf32>
    %c0_3 = arith.constant 0 : index
    %c0_4 = arith.constant 0 : index
    %5 = vector.load %arg3[%c0_3, %c0_4] : memref<1x128xf32, #tpu.memory_space<vmem>>, vector<1x128xf32>
    %6 = vector.broadcast %5 : vector<1x128xf32> to vector<128x128xf32>
    %7 = arith.addf %4, %6 : vector<128x128xf32>
    %8 = arith.truncf %7 : vector<128x128xf32> to vector<128x128xbf16>
    %c0_5 = arith.constant 0 : index
    %c0_6 = arith.constant 0 : index
    %9 = vector.load %arg4[%c0_5, %c0_6] : memref<128x128xbf16, #tpu.memory_space<vmem>>, vector<128x128xbf16>
    tpu.vector_store %arg4[%c0_5, %c0_6], %8 {strides = array<i32>} : memref<128x128xbf16, #tpu.memory_space<vmem>>, vector<128x128xbf16>,
    return
  }
  func.func @transform_0(%arg0: i32) -> (i32, i32) {
    %c0_i32 = arith.constant 0 : i32
    %c0_i32_0 = arith.constant 0 : i32
    return %arg0, %c0_i32 : i32, i32
  }
  func.func @transform_1(%arg0: i32) -> (i32, i32) {
    %c0_i32 = arith.constant 0 : i32
    %c0_i32_0 = arith.constant 0 : i32
    %c0_i32_1 = arith.constant 0 : i32
    return %c0_i32, %c0_i32_0 : i32, i32
  }
  func.func @transform_2(%arg0: i32) -> (i32, i32) {
    %c0_i32 = arith.constant 0 : i32
    %c0_i32_0 = arith.constant 0 : i32
    %c0_i32_1 = arith.constant 0 : i32
    return %c0_i32, %c0_i32_0 : i32, i32
  }
  func.func @transform_3(%arg0: i32) -> (i32, i32) {
    %c0_i32 = arith.constant 0 : i32
    %c0_i32_0 = arith.constant 0 : i32
    return %arg0, %c0_i32 : i32, i32
  }
}

</mosaic_0001>

<bundles_post_ra>
// kernel: basic_block_forward.6
= control target key start
LH: loop header
LB: loop body
LE: loop exit
PB: predicated region body
PF: predicated region fallthrough
CT: control target
= control target key end

     0   :  { %s630_s1 = inlined_call_operand.vmem [shape: bf16[128,128], index: 1, kind: input, shape index: {}]   ;;  %s631_s0 = inlined_call_operand.vmem [shape: bf16[128,128], index: 0, kind: input, shape index: {}]   ;;  %s632_s2 = inlined_call_operand.vmem [shape: bf16[128,128], index: 2, kind: output, shape index: {0}]   ;;  %s633_s3 = inlined_call_operand.vmem [shape: f32[8,128], index: 3, kind: output, shape index: {1}]   ;;  %s634_s4 = inlined_call_operand.vmem [shape: f32[8,128], index: 4, kind: output, shape index: {2}]  }
   0x1   :  { %v448_v0 = vld [vmem:[%s630_s1 + $0x38] sm:$0xff]  ;;  %v447_v1 = vld [vmem:[%s630_s1 + $0x30] sm:$0xff]  ;;  %v446_v2 = vld [vmem:[%s630_s1 + $0x28] sm:$0xff] }
   0x2   :  { %184 = vmatpush.bf16.msra.mxu0 %v448_v0  ;;  %496 = vmatpush.bf16.msra.mxu1 %v448_v0  ;;  %v445_v3 = vld [vmem:[%s630_s1 + $0x20] sm:$0xff]  ;;  %v444_v4 = vld [vmem:[%s630_s1 + $0x18] sm:$0xff]  ;;  %v443_v5 = vld [vmem:[%s630_s1 + $0x10] sm:$0xff] }
   0x3   :  { %497 = vmatpush.bf16.msra.mxu2 %v448_v0  ;;  %498 = vmatpush.bf16.msra.mxu3 %v448_v0  ;;  %v442_v6 = vld [vmem:[%s630_s1 + $0x8] sm:$0xff]  ;;  %v441_v7 = vld [vmem:[%s630_s1] sm:$0xff]  ;;  %v435_v9 = vld [vmem:[%s631_s0 + $0x10] sm:$0xff] }
   0x4   :  { %v433_v8 = vld [vmem:[%s631_s0] sm:$0xff]  ;;  %v439_v11 = vld [vmem:[%s631_s0 + $0x30] sm:$0xff]  ;;  %v434_v12 = vld [vmem:[%s631_s0 + $0x8] sm:$0xff] }
   0x5   :  { %v437_v10 = vld [vmem:[%s631_s0 + $0x20] sm:$0xff]  ;;  %v436_v13 = vld [vmem:[%s631_s0 + $0x18] sm:$0xff]  ;;  %v438_v14 = vld [vmem:[%s631_s0 + $0x28] sm:$0xff] }
   0x6   :  { %185 = vmatpush.bf16.msra.mxu0 %v447_v1  ;;  %499 = vmatpush.bf16.msra.mxu1 %v447_v1  ;;  %v440_v15 = vld [vmem:[%s631_s0 + $0x38] sm:$0xff] }
   0x7   :  { %500 = vmatpush.bf16.msra.mxu2 %v447_v1  ;;  %501 = vmatpush.bf16.msra.mxu3 %v447_v1 }
   0xa   :  { %186 = vmatpush.bf16.msra.mxu0 %v446_v2  ;;  %502 = vmatpush.bf16.msra.mxu1 %v446_v2 }
   0xb   :  { %503 = vmatpush.bf16.msra.mxu2 %v446_v2  ;;  %504 = vmatpush.bf16.msra.mxu3 %v446_v2 }
   0xe   :  { %187 = vmatpush.bf16.msra.mxu0 %v445_v3  ;;  %505 = vmatpush.bf16.msra.mxu1 %v445_v3 }
   0xf   :  { %506 = vmatpush.bf16.msra.mxu2 %v445_v3  ;;  %507 = vmatpush.bf16.msra.mxu3 %v445_v3 }
  0x12   :  { %188 = vmatpush.bf16.msra.mxu0 %v444_v4  ;;  %508 = vmatpush.bf16.msra.mxu1 %v444_v4 }
  0x13   :  { %509 = vmatpush.bf16.msra.mxu2 %v444_v4  ;;  %510 = vmatpush.bf16.msra.mxu3 %v444_v4 }
  0x16   :  { %189 = vmatpush.bf16.msra.mxu0 %v443_v5  ;;  %511 = vmatpush.bf16.msra.mxu1 %v443_v5 }
  0x17   :  { %512 = vmatpush.bf16.msra.mxu2 %v443_v5  ;;  %513 = vmatpush.bf16.msra.mxu3 %v443_v5 }
  0x1a   :  { %190 = vmatpush.bf16.msra.mxu0 %v442_v6  ;;  %514 = vmatpush.bf16.msra.mxu1 %v442_v6 }
  0x1b   :  { %515 = vmatpush.bf16.msra.mxu2 %v442_v6  ;;  %516 = vmatpush.bf16.msra.mxu3 %v442_v6 }
  0x1e   :  { %191 = vmatpush.bf16.msra.mxu0 %v441_v7  ;;  %517 = vmatpush.bf16.msra.mxu1 %v441_v7 }
  0x1f   :  { %518 = vmatpush.bf16.msra.mxu2 %v441_v7  ;;  %519 = vmatpush.bf16.msra.mxu3 %v441_v7 }
  0x21   :  { %192 = vmatmul.bf16.vlgmr.msra.gmra.mxu0 %v433_v8  ;;  %202 = vmatmul.bf16.vlgmr.msra.gmra.mxu1 %v435_v9 }
  0x22   :  { %212 = vmatmul.bf16.vlgmr.msra.gmra.mxu2 %v437_v10  ;;  %222 = vmatmul.bf16.vlgmr.msra.gmra.mxu3 %v439_v11 }
  0x31   :  { %197 = vmatmul.bf16.gmra.mxu0 %v434_v12  ;;  %207 = vmatmul.bf16.gmra.mxu1 %v436_v13 }
  0x32   :  { %217 = vmatmul.bf16.gmra.mxu2 %v438_v14  ;;  %227 = vmatmul.bf16.gmra.mxu3 %v440_v15 }
  0x9e   :  { %v193_v16 = vpop.f32.mrf.mxu0  ;;  %v203_v17 = vpop.f32.mrf.mxu1 }
  0x9f   :  { %v290_v31 = vmul.f32 %v193_v16, %v193_v16  ;;  %v294_v45 = vmul.f32 %v203_v17, %v203_v17 }
  0xa5   :  { %v213_v18 = vpop.f32.mrf.mxu2  ;;  %v594_v19 = vpop.f32.mrf.mxu3 }
  0xa6   :  { %v195_v20 = vpop.f32.mrf.mxu0  ;;  %v205_v21 = vpop.f32.mrf.mxu1  ;;  %v298_v61 = vmul.f32 %v213_v18, %v213_v18  ;;  %v302_v9 = vmul.f32 %v594_v19, %v594_v19 }
  0xa7   :  { %v452_v22 = vpack.c.bf16 %v195_v20, %v193_v16  ;;  %v462_v23 = vpack.c.bf16 %v205_v21, %v203_v17  ;;  %v291_v30 = vmul.f32 %v195_v20, %v195_v20  ;;  %v266_v33 = vadd.f32 %v195_v20, %v193_v16 }
  0xa8   :  { %v295_v48 = vmul.f32 %v205_v21, %v205_v21 }
  0xa9   :  { %453 = vst [vmem:[%s632_s2] sm:$0xff] %v452_v22   ;;  %v306_v34 = vadd.f32 %v291_v30, %v290_v31 }
  0xaa   :  { %490 = vst [vmem:[%s632_s2 + $0x10] sm:$0xff] %v462_v23  }
  0xad   :  { %v215_v24 = vpop.f32.mrf.mxu2  ;;  %v225_v25 = vpop.f32.mrf.mxu3 }
  0xae   :  { %v198_v26 = vpop.f32.mrf.mxu0  ;;  %v208_v27 = vpop.f32.mrf.mxu1  ;;  %v472_v28 = vpack.c.bf16 %v215_v24, %v213_v18  ;;  %v482_v29 = vpack.c.bf16 %v225_v25, %v594_v19  ;;  %v299_v0 = vmul.f32 %v215_v24, %v215_v24  ;;  %v303_v12 = vmul.f32 %v225_v25, %v225_v25 }
  0xaf   :  { %v292_v32 = vmul.f32 %v198_v26, %v198_v26  ;;  %v267_v35 = vadd.f32 %v266_v33, %v198_v26  ;;  %v296_v51 = vmul.f32 %v208_v27, %v208_v27 }
  0xb0   :  { %492 = vst [vmem:[%s632_s2 + $0x20] sm:$0xff] %v472_v28  }
  0xb1   :  { %494 = vst [vmem:[%s632_s2 + $0x30] sm:$0xff] %v482_v29   ;;  %v307_v38 = vadd.f32 %v306_v34, %v292_v32 }
  0xb5   :  { %v218_v36 = vpop.f32.mrf.mxu2  ;;  %v228_v37 = vpop.f32.mrf.mxu3 }
  0xb6   :  { %v200_v39 = vpop.f32.mrf.mxu0  ;;  %v210_v40 = vpop.f32.mrf.mxu1  ;;  %v300_v4 = vmul.f32 %v218_v36, %v218_v36  ;;  %v304_v16 = vmul.f32 %v228_v37, %v228_v37 }
  0xb7   :  { %v457_v41 = vpack.c.bf16 %v200_v39, %v198_v26  ;;  %v268_v42 = vadd.f32 %v267_v35, %v200_v39  ;;  %v293_v43 = vmul.f32 %v200_v39, %v200_v39  ;;  %v467_v44 = vpack.c.bf16 %v210_v40, %v208_v27 }
  0xb8   :  { %v297_v59 = vmul.f32 %v210_v40, %v210_v40 }
  0xb9   :  { %489 = vst [vmem:[%s632_s2 + $0x8] sm:$0xff] %v457_v41   ;;  %v269_v46 = vadd.f32 %v268_v42, %v203_v17  ;;  %v308_v47 = vadd.f32 %v307_v38, %v293_v43 }
  0xba   :  { %491 = vst [vmem:[%s632_s2 + $0x18] sm:$0xff] %v467_v44  }
  0xbb   :  { %v309_v49 = vadd.f32 %v308_v47, %v294_v45  ;;  %v270_v50 = vadd.f32 %v269_v46, %v205_v21 }
  0xbd   :  { %v271_v52 = vadd.f32 %v270_v50, %v208_v27  ;;  %v310_v53 = vadd.f32 %v309_v49, %v295_v48  ;;  %v220_v54 = vpop.f32.mrf.mxu2  ;;  %v230_v55 = vpop.f32.mrf.mxu3 }
  0xbe   :  { %v477_v56 = vpack.c.bf16 %v220_v54, %v218_v36  ;;  %v487_v57 = vpack.c.bf16 %v230_v55, %v228_v37  ;;  %v301_v8 = vmul.f32 %v220_v54, %v220_v54  ;;  %v305_v21 = vmul.f32 %v230_v55, %v230_v55 }
  0xbf   :  { %v272_v58 = vadd.f32 %v271_v52, %v210_v40  ;;  %v311_v60 = vadd.f32 %v310_v53, %v296_v51 }
  0xc0   :  { %493 = vst [vmem:[%s632_s2 + $0x28] sm:$0xff] %v477_v56  }
  0xc1   :  { %v273_v62 = vadd.f32 %v272_v58, %v213_v18  ;;  %v312_v63 = vadd.f32 %v311_v60, %v297_v59  ;;  %495 = vst [vmem:[%s632_s2 + $0x38] sm:$0xff] %v487_v57  }
  0xc3   :  { %v313_v1 = vadd.f32 %v312_v63, %v298_v61  ;;  %v274_v2 = vadd.f32 %v273_v62, %v215_v24 }
  0xc5   :  { %v275_v3 = vadd.f32 %v274_v2, %v218_v36  ;;  %v314_v5 = vadd.f32 %v313_v1, %v299_v0 }
  0xc7   :  { %v315_v6 = vadd.f32 %v314_v5, %v300_v4  ;;  %v276_v7 = vadd.f32 %v275_v3, %v220_v54 }
  0xc9   :  { %v277_v10 = vadd.f32 %v276_v7, %v594_v19  ;;  %v316_v11 = vadd.f32 %v315_v6, %v301_v8 }
  0xcb   :  { %v317_v13 = vadd.f32 %v316_v11, %v302_v9  ;;  %v278_v14 = vadd.f32 %v277_v10, %v225_v25 }
  0xcd   :  { %v279_v15 = vadd.f32 %v278_v14, %v228_v37  ;;  %v318_v17 = vadd.f32 %v317_v13, %v303_v12 }
  0xcf   :  { %v319_v18 = vadd.f32 %v318_v17, %v304_v16  ;;  %v280_v20 = vadd.f32 %v279_v15, %v230_v55 }
  0xd1   :  { %v281_v22 = vrot.slane %v280_v20, 4  ;;  %v320_v23 = vadd.f32 %v319_v18, %v305_v21 }
  0xd3   :  { %v282_v24 = vadd.f32 %v281_v22, %v280_v20  ;;  %v321_v26 = vrot.slane %v320_v23, 4 }
  0xd5   :  { %v283_v27 = vrot.slane %v282_v24, 2  ;;  %v322_v28 = vadd.f32 %v321_v26, %v320_v23 }
  0xd7   :  { %v284_v29 = vadd.f32 %v283_v27, %v282_v24  ;;  %v323_v30 = vrot.slane %v322_v28, 2 }
  0xd9   :  { %v285_v31 = vrot.slane %v284_v29, 1  ;;  %v324_v19 = vadd.f32 %v323_v30, %v322_v28 }
  0xdb   :  { %v286_v32 = vadd.f32 %v285_v31, %v284_v29  ;;  %v325_v33 = vrot.slane %v324_v19, 1 }
  0xdd   :  { %v326_v34 = vadd.f32 %v325_v33, %v324_v19  ;;  %288 = vst [vmem:[%s633_s3] sm:$0xff] %v286_v32 }
  0xdf   :  { %328 = vst [vmem:[%s634_s4] sm:$0xff] %v326_v34 }

// kernel: basic_block_forward.7
= control target key start
LH: loop header
LB: loop body
LE: loop exit
PB: predicated region body
PF: predicated region fallthrough
CT: control target
= control target key end

     0   :  { %s336_s0 = inlined_call_operand.vmem [shape: bf16[128,128], index: 0, kind: input, shape index: {}]   ;;  %s337_s1 = inlined_call_operand.vmem [shape: f32[1,128], index: 1, kind: input, shape index: {}]   ;;  %s338_s2 = inlined_call_operand.vmem [shape: f32[1,128], index: 2, kind: input, shape index: {}]   ;;  %s339_s3 = inlined_call_operand.vmem [shape: bf16[128,128], index: 3, kind: output, shape index: {}]  }
   0x1   :  { %v139_v0 = vld [vmem:[%s336_s0] sm:$0xff]   ;;  %v210_v5 = vld [vmem:[%s336_s0 + $0x8] sm:$0xff]   ;;  %v211_v8 = vld [vmem:[%s336_s0 + $0x10] sm:$0xff]  }
   0x2   :  { %v252_v1 = vld [vmem:[%s337_s1] ss:$0 sm:$0xff]  ;;  %v140_v2 = vunpack.c.l.bf16 %v139_v0  ;;  %v141_v3 = vunpack.c.h.bf16 %v139_v0  ;;  %v144_v6 = vunpack.c.l.bf16 %v210_v5  ;;  %v145_v7 = vunpack.c.h.bf16 %v210_v5  ;;  %v212_v9 = vld [vmem:[%s336_s0 + $0x18] sm:$0xff]   ;;  %v214_v35 = vld [vmem:[%s336_s0 + $0x28] sm:$0xff]  }
   0x3   :  { %v257_v4 = vld [vmem:[%s338_s2] ss:$0 sm:$0xff]  ;;  %v148_v12 = vunpack.c.l.bf16 %v211_v8  ;;  %v149_v13 = vunpack.c.h.bf16 %v211_v8  ;;  %v152_v16 = vunpack.c.l.bf16 %v212_v9  ;;  %v153_v17 = vunpack.c.h.bf16 %v212_v9  ;;  %v215_v40 = vld [vmem:[%s336_s0 + $0x30] sm:$0xff]   ;;  %v216_v45 = vld [vmem:[%s336_s0 + $0x38] sm:$0xff]  }
   0x4   :  { %v50_v10 = vmul.f32 %v252_v1, %v140_v2  ;;  %v51_v11 = vmul.f32 %v252_v1, %v141_v3  ;;  %v52_v14 = vmul.f32 %v252_v1, %v144_v6  ;;  %v53_v15 = vmul.f32 %v252_v1, %v145_v7  ;;  %v213_v26 = vld [vmem:[%s336_s0 + $0x20] sm:$0xff]  }
   0x5   :  { %v54_v20 = vmul.f32 %v252_v1, %v148_v12  ;;  %v55_v21 = vmul.f32 %v252_v1, %v149_v13  ;;  %v56_v24 = vmul.f32 %v252_v1, %v152_v16  ;;  %v57_v25 = vmul.f32 %v252_v1, %v153_v17 }
   0x6   :  { %v70_v18 = vadd.f32 %v257_v4, %v50_v10  ;;  %v71_v19 = vadd.f32 %v257_v4, %v51_v11  ;;  %v72_v22 = vadd.f32 %v257_v4, %v52_v14  ;;  %v73_v23 = vadd.f32 %v257_v4, %v53_v15 }
   0x7   :  { %v74_v29 = vadd.f32 %v257_v4, %v54_v20  ;;  %v75_v30 = vadd.f32 %v257_v4, %v55_v21  ;;  %v76_v33 = vadd.f32 %v257_v4, %v56_v24  ;;  %v77_v34 = vadd.f32 %v257_v4, %v57_v25 }
   0x8   :  { %v86_v27 = vmax.f32 %v70_v18, 0.0  ;;  %v87_v28 = vmax.f32 %v71_v19, 0.0  ;;  %v88_v31 = vmax.f32 %v72_v22, 0.0  ;;  %v89_v32 = vmax.f32 %v73_v23, 0.0 }
   0x9   :  { %v90_v37 = vmax.f32 %v74_v29, 0.0  ;;  %v91_v38 = vmax.f32 %v75_v30, 0.0  ;;  %v156_v39 = vunpack.c.l.bf16 %v213_v26  ;;  %v92_v42 = vmax.f32 %v76_v33, 0.0 }
   0xa   :  { %v173_v36 = vpack.c.bf16 %v87_v28, %v86_v27  ;;  %v178_v41 = vpack.c.bf16 %v89_v32, %v88_v31  ;;  %v93_v43 = vmax.f32 %v77_v34, 0.0  ;;  %v157_v44 = vunpack.c.h.bf16 %v213_v26 }
   0xb   :  { %v183_v46 = vpack.c.bf16 %v91_v38, %v90_v37  ;;  %v58_v47 = vmul.f32 %v252_v1, %v156_v39  ;;  %v160_v48 = vunpack.c.l.bf16 %v214_v35  ;;  %v161_v49 = vunpack.c.h.bf16 %v214_v35 }
   0xc   :  { %174 = vst [vmem:[%s339_s3] sm:$0xff] %v173_v36   ;;  %v188_v50 = vpack.c.bf16 %v93_v43, %v92_v42  ;;  %v59_v51 = vmul.f32 %v252_v1, %v157_v44  ;;  %v164_v52 = vunpack.c.l.bf16 %v215_v40  ;;  %v165_v53 = vunpack.c.h.bf16 %v215_v40 }
   0xd   :  { %217 = vst [vmem:[%s339_s3 + $0x8] sm:$0xff] %v178_v41   ;;  %v78_v54 = vadd.f32 %v257_v4, %v58_v47  ;;  %v60_v55 = vmul.f32 %v252_v1, %v160_v48  ;;  %v61_v56 = vmul.f32 %v252_v1, %v161_v49  ;;  %v168_v57 = vunpack.c.l.bf16 %v216_v45 }
   0xe   :  { %218 = vst [vmem:[%s339_s3 + $0x10] sm:$0xff] %v183_v46   ;;  %v79_v58 = vadd.f32 %v257_v4, %v59_v51  ;;  %v62_v59 = vmul.f32 %v252_v1, %v164_v52  ;;  %v63_v60 = vmul.f32 %v252_v1, %v165_v53  ;;  %v169_v61 = vunpack.c.h.bf16 %v216_v45 }
   0xf   :  { %219 = vst [vmem:[%s339_s3 + $0x18] sm:$0xff] %v188_v50   ;;  %v94_v62 = vmax.f32 %v78_v54, 0.0  ;;  %v80_v63 = vadd.f32 %v257_v4, %v60_v55  ;;  %v81_v0 = vadd.f32 %v257_v4, %v61_v56  ;;  %v64_v2 = vmul.f32 %v252_v1, %v168_v57 }
  0x10   :  { %v95_v3 = vmax.f32 %v79_v58, 0.0  ;;  %v82_v5 = vadd.f32 %v257_v4, %v62_v59  ;;  %v83_v6 = vadd.f32 %v257_v4, %v63_v60  ;;  %v65_v7 = vmul.f32 %v252_v1, %v169_v61 }
  0x11   :  { %v96_v8 = vmax.f32 %v80_v63, 0.0  ;;  %v97_v9 = vmax.f32 %v81_v0, 0.0  ;;  %v84_v10 = vadd.f32 %v257_v4, %v64_v2 }
  0x12   :  { %v193_v11 = vpack.c.bf16 %v95_v3, %v94_v62  ;;  %v98_v12 = vmax.f32 %v82_v5, 0.0  ;;  %v99_v13 = vmax.f32 %v83_v6, 0.0  ;;  %v85_v14 = vadd.f32 %v257_v4, %v65_v7 }
  0x13   :  { %v198_v15 = vpack.c.bf16 %v97_v9, %v96_v8  ;;  %v100_v16 = vmax.f32 %v84_v10, 0.0 }
  0x14   :  { %220 = vst [vmem:[%s339_s3 + $0x20] sm:$0xff] %v193_v11   ;;  %v203_v17 = vpack.c.bf16 %v99_v13, %v98_v12  ;;  %v101_v18 = vmax.f32 %v85_v14, 0.0 }
  0x15   :  { %221 = vst [vmem:[%s339_s3 + $0x28] sm:$0xff] %v198_v15  }
  0x16   :  { %222 = vst [vmem:[%s339_s3 + $0x30] sm:$0xff] %v203_v17   ;;  %v208_v1 = vpack.c.bf16 %v101_v18, %v100_v16 }
  0x18   :  { %223 = vst [vmem:[%s339_s3 + $0x38] sm:$0xff] %v208_v1  }

// kernel: basic_block_forward.9
= control target key start
LH: loop header
LB: loop body
LE: loop exit
PB: predicated region body
PF: predicated region fallthrough
CT: control target
= control target key end

     0   :  { %s320_s0 = inlined_call_operand.vmem [shape: bf16[128,128], index: 0, kind: input, shape index: {}]   ;;  %s321_s1 = inlined_call_operand.vmem [shape: f32[1,128], index: 1, kind: input, shape index: {}]   ;;  %s322_s2 = inlined_call_operand.vmem [shape: f32[1,128], index: 2, kind: input, shape index: {}]   ;;  %s323_s3 = inlined_call_operand.vmem [shape: bf16[128,128], index: 3, kind: output, shape index: {}]  }
   0x1   :  { %v123_v0 = vld [vmem:[%s320_s0] sm:$0xff]   ;;  %v194_v5 = vld [vmem:[%s320_s0 + $0x8] sm:$0xff]   ;;  %v195_v8 = vld [vmem:[%s320_s0 + $0x10] sm:$0xff]  }
   0x2   :  { %v236_v1 = vld [vmem:[%s321_s1] ss:$0 sm:$0xff]  ;;  %v124_v2 = vunpack.c.l.bf16 %v123_v0  ;;  %v125_v3 = vunpack.c.h.bf16 %v123_v0  ;;  %v128_v6 = vunpack.c.l.bf16 %v194_v5  ;;  %v129_v7 = vunpack.c.h.bf16 %v194_v5  ;;  %v196_v9 = vld [vmem:[%s320_s0 + $0x18] sm:$0xff]   ;;  %v198_v27 = vld [vmem:[%s320_s0 + $0x28] sm:$0xff]  }
   0x3   :  { %v241_v4 = vld [vmem:[%s322_s2] ss:$0 sm:$0xff]  ;;  %v132_v12 = vunpack.c.l.bf16 %v195_v8  ;;  %v133_v13 = vunpack.c.h.bf16 %v195_v8  ;;  %v136_v16 = vunpack.c.l.bf16 %v196_v9  ;;  %v137_v17 = vunpack.c.h.bf16 %v196_v9  ;;  %v199_v32 = vld [vmem:[%s320_s0 + $0x30] sm:$0xff]   ;;  %v200_v37 = vld [vmem:[%s320_s0 + $0x38] sm:$0xff]  }
   0x4   :  { %v50_v10 = vmul.f32 %v236_v1, %v124_v2  ;;  %v51_v11 = vmul.f32 %v236_v1, %v125_v3  ;;  %v52_v14 = vmul.f32 %v236_v1, %v128_v6  ;;  %v53_v15 = vmul.f32 %v236_v1, %v129_v7  ;;  %v197_v18 = vld [vmem:[%s320_s0 + $0x20] sm:$0xff]  }
   0x5   :  { %v54_v21 = vmul.f32 %v236_v1, %v132_v12  ;;  %v55_v22 = vmul.f32 %v236_v1, %v133_v13  ;;  %v56_v25 = vmul.f32 %v236_v1, %v136_v16  ;;  %v57_v26 = vmul.f32 %v236_v1, %v137_v17 }
   0x6   :  { %v70_v19 = vadd.f32 %v241_v4, %v50_v10  ;;  %v71_v20 = vadd.f32 %v241_v4, %v51_v11  ;;  %v72_v23 = vadd.f32 %v241_v4, %v52_v14  ;;  %v73_v24 = vadd.f32 %v241_v4, %v53_v15 }
   0x7   :  { %v74_v29 = vadd.f32 %v241_v4, %v54_v21  ;;  %v75_v30 = vadd.f32 %v241_v4, %v55_v22  ;;  %v140_v31 = vunpack.c.l.bf16 %v197_v18  ;;  %v76_v34 = vadd.f32 %v241_v4, %v56_v25 }
   0x8   :  { %v157_v28 = vpack.c.bf16 %v71_v20, %v70_v19  ;;  %v162_v33 = vpack.c.bf16 %v73_v24, %v72_v23  ;;  %v77_v35 = vadd.f32 %v241_v4, %v57_v26  ;;  %v141_v36 = vunpack.c.h.bf16 %v197_v18 }
   0x9   :  { %v167_v38 = vpack.c.bf16 %v75_v30, %v74_v29  ;;  %v58_v39 = vmul.f32 %v236_v1, %v140_v31  ;;  %v144_v40 = vunpack.c.l.bf16 %v198_v27  ;;  %v145_v41 = vunpack.c.h.bf16 %v198_v27 }
   0xa   :  { %158 = vst [vmem:[%s323_s3] sm:$0xff] %v157_v28   ;;  %v172_v42 = vpack.c.bf16 %v77_v35, %v76_v34  ;;  %v59_v43 = vmul.f32 %v236_v1, %v141_v36  ;;  %v148_v44 = vunpack.c.l.bf16 %v199_v32  ;;  %v149_v45 = vunpack.c.h.bf16 %v199_v32 }
   0xb   :  { %201 = vst [vmem:[%s323_s3 + $0x8] sm:$0xff] %v162_v33   ;;  %v78_v46 = vadd.f32 %v241_v4, %v58_v39  ;;  %v60_v47 = vmul.f32 %v236_v1, %v144_v40  ;;  %v61_v48 = vmul.f32 %v236_v1, %v145_v41  ;;  %v152_v49 = vunpack.c.l.bf16 %v200_v37 }
   0xc   :  { %202 = vst [vmem:[%s323_s3 + $0x10] sm:$0xff] %v167_v38   ;;  %v79_v50 = vadd.f32 %v241_v4, %v59_v43  ;;  %v62_v51 = vmul.f32 %v236_v1, %v148_v44  ;;  %v63_v52 = vmul.f32 %v236_v1, %v149_v45  ;;  %v153_v53 = vunpack.c.h.bf16 %v200_v37 }
   0xd   :  { %203 = vst [vmem:[%s323_s3 + $0x18] sm:$0xff] %v172_v42   ;;  %v80_v54 = vadd.f32 %v241_v4, %v60_v47  ;;  %v81_v55 = vadd.f32 %v241_v4, %v61_v48  ;;  %v64_v56 = vmul.f32 %v236_v1, %v152_v49 }
   0xe   :  { %v177_v57 = vpack.c.bf16 %v79_v50, %v78_v46  ;;  %v82_v58 = vadd.f32 %v241_v4, %v62_v51  ;;  %v83_v59 = vadd.f32 %v241_v4, %v63_v52  ;;  %v65_v60 = vmul.f32 %v236_v1, %v153_v53 }
   0xf   :  { %v182_v61 = vpack.c.bf16 %v81_v55, %v80_v54  ;;  %v84_v62 = vadd.f32 %v241_v4, %v64_v56 }
  0x10   :  { %204 = vst [vmem:[%s323_s3 + $0x20] sm:$0xff] %v177_v57   ;;  %v187_v63 = vpack.c.bf16 %v83_v59, %v82_v58  ;;  %v85_v0 = vadd.f32 %v241_v4, %v65_v60 }
  0x11   :  { %205 = vst [vmem:[%s323_s3 + $0x28] sm:$0xff] %v182_v61  }
  0x12   :  { %206 = vst [vmem:[%s323_s3 + $0x30] sm:$0xff] %v187_v63   ;;  %v192_v2 = vpack.c.bf16 %v85_v0, %v84_v62 }
  0x14   :  { %207 = vst [vmem:[%s323_s3 + $0x38] sm:$0xff] %v192_v2  }

// kernel: basic_block_forward.11
= control target key start
LH: loop header
LB: loop body
LE: loop exit
PB: predicated region body
PF: predicated region fallthrough
CT: control target
= control target key end

     0   :  { %s416_s0 = inlined_call_operand.vmem [shape: bf16[128,128], index: 0, kind: input, shape index: {}]   ;;  %s417_s1 = inlined_call_operand.vmem [shape: f32[1,128], index: 1, kind: input, shape index: {}]   ;;  %s418_s2 = inlined_call_operand.vmem [shape: f32[1,128], index: 2, kind: input, shape index: {}]   ;;  %s419_s3 = inlined_call_operand.vmem [shape: bf16[128,128], index: 3, kind: input, shape index: {}]   ;;  %s420_s4 = inlined_call_operand.vmem [shape: f32[128,128], index: 4, kind: output, shape index: {}]  }
   0x1   :  { %v174_v0 = vld [vmem:[%s416_s0] sm:$0xff]   ;;  %v237_v8 = vld [vmem:[%s416_s0 + $0x8] sm:$0xff]   ;;  %v238_v10 = vld [vmem:[%s416_s0 + $0x10] sm:$0xff]  }
   0x2   :  { %v284_v1 = vld [vmem:[%s417_s1] ss:$0 sm:$0xff]  ;;  %v175_v2 = vunpack.c.l.bf16 %v174_v0  ;;  %v176_v5 = vunpack.c.h.bf16 %v174_v0  ;;  %v244_v9 = vld [vmem:[%s419_s3 + $0x8] sm:$0xff]   ;;  %v179_v13 = vunpack.c.l.bf16 %v237_v8  ;;  %v245_v15 = vld [vmem:[%s419_s3 + $0x10] sm:$0xff]   ;;  %v180_v17 = vunpack.c.h.bf16 %v237_v8 }
   0x3   :  { %v289_v3 = vld [vmem:[%s418_s2] ss:$0 sm:$0xff]  ;;  %v211_v14 = vunpack.c.l.bf16 %v244_v9  ;;  %v239_v16 = vld [vmem:[%s416_s0 + $0x18] sm:$0xff]   ;;  %v212_v18 = vunpack.c.h.bf16 %v244_v9  ;;  %v183_v19 = vunpack.c.l.bf16 %v238_v10  ;;  %v215_v20 = vunpack.c.l.bf16 %v245_v15  ;;  %v241_v52 = vld [vmem:[%s416_s0 + $0x28] sm:$0xff]  }
   0x4   :  { %v206_v4 = vld [vmem:[%s419_s3] sm:$0xff]   ;;  %v53_v11 = vmul.f32 %v284_v1, %v175_v2  ;;  %v54_v12 = vmul.f32 %v284_v1, %v176_v5  ;;  %v55_v23 = vmul.f32 %v284_v1, %v179_v13  ;;  %v184_v24 = vunpack.c.h.bf16 %v238_v10  ;;  %v246_v25 = vld [vmem:[%s419_s3 + $0x18] sm:$0xff]   ;;  %v248_v57 = vld [vmem:[%s419_s3 + $0x28] sm:$0xff]  }
   0x5   :  { %v207_v6 = vunpack.c.l.bf16 %v206_v4  ;;  %v208_v7 = vunpack.c.h.bf16 %v206_v4  ;;  %v56_v26 = vmul.f32 %v284_v1, %v180_v17  ;;  %v57_v27 = vmul.f32 %v284_v1, %v183_v19  ;;  %v240_v38 = vld [vmem:[%s416_s0 + $0x20] sm:$0xff]   ;;  %v242_v62 = vld [vmem:[%s416_s0 + $0x30] sm:$0xff]  }
   0x6   :  { %v73_v21 = vadd.f32 %v289_v3, %v53_v11  ;;  %v74_v22 = vadd.f32 %v289_v3, %v54_v12  ;;  %v216_v28 = vunpack.c.h.bf16 %v245_v15  ;;  %v187_v29 = vunpack.c.l.bf16 %v239_v16  ;;  %v247_v47 = vld [vmem:[%s419_s3 + $0x20] sm:$0xff]   ;;  %v249_v5 = vld [vmem:[%s419_s3 + $0x30] sm:$0xff]  }
   0x7   :  { %v75_v32 = vadd.f32 %v289_v3, %v55_v23  ;;  %v58_v33 = vmul.f32 %v284_v1, %v184_v24  ;;  %v76_v34 = vadd.f32 %v289_v3, %v56_v26  ;;  %v77_v35 = vadd.f32 %v289_v3, %v57_v27  ;;  %v250_v23 = vld [vmem:[%s419_s3 + $0x38] sm:$0xff]  }
   0x8   :  { %v121_v30 = vadd.f32 %v207_v6, %v73_v21  ;;  %v122_v31 = vadd.f32 %v208_v7, %v74_v22  ;;  %v59_v36 = vmul.f32 %v284_v1, %v187_v29  ;;  %v219_v37 = vunpack.c.l.bf16 %v246_v25 }
   0x9   :  { %v123_v41 = vadd.f32 %v211_v14, %v75_v32  ;;  %v78_v42 = vadd.f32 %v289_v3, %v58_v33  ;;  %v124_v43 = vadd.f32 %v212_v18, %v76_v34  ;;  %v125_v44 = vadd.f32 %v215_v20, %v77_v35  ;;  %v243_v18 = vld [vmem:[%s416_s0 + $0x38] sm:$0xff]  }
   0xa   :  { %v137_v39 = vmax.f32 %v121_v30, 0.0  ;;  %v138_v40 = vmax.f32 %v122_v31, 0.0  ;;  %v79_v45 = vadd.f32 %v289_v3, %v59_v36  ;;  %v188_v46 = vunpack.c.h.bf16 %v239_v16 }
   0xb   :  { %v139_v48 = vmax.f32 %v123_v41, 0.0  ;;  %v126_v49 = vadd.f32 %v216_v28, %v78_v42  ;;  %v220_v50 = vunpack.c.h.bf16 %v246_v25  ;;  %v191_v51 = vunpack.c.l.bf16 %v240_v38 }
   0xc   :  { %153 = vst [vmem:[%s420_s4] sm:$0xff] %v137_v39  ;;  %v140_v53 = vmax.f32 %v124_v43, 0.0  ;;  %v141_v54 = vmax.f32 %v125_v44, 0.0  ;;  %v127_v55 = vadd.f32 %v219_v37, %v79_v45  ;;  %v60_v56 = vmul.f32 %v284_v1, %v188_v46 }
   0xd   :  { %154 = vst [vmem:[%s420_s4 + $0x8] sm:$0xff] %v138_v40  ;;  %v142_v58 = vmax.f32 %v126_v49, 0.0  ;;  %v61_v59 = vmul.f32 %v284_v1, %v191_v51  ;;  %v223_v60 = vunpack.c.l.bf16 %v247_v47  ;;  %v192_v61 = vunpack.c.h.bf16 %v240_v38 }
   0xe   :  { %155 = vst [vmem:[%s420_s4 + $0x10] sm:$0xff] %v139_v48  ;;  %v143_v63 = vmax.f32 %v127_v55, 0.0  ;;  %v80_v0 = vadd.f32 %v289_v3, %v60_v56  ;;  %v224_v2 = vunpack.c.h.bf16 %v247_v47  ;;  %v195_v4 = vunpack.c.l.bf16 %v241_v52 }
   0xf   :  { %156 = vst [vmem:[%s420_s4 + $0x18] sm:$0xff] %v140_v53  ;;  %v81_v6 = vadd.f32 %v289_v3, %v61_v59  ;;  %v62_v7 = vmul.f32 %v284_v1, %v192_v61  ;;  %v227_v8 = vunpack.c.l.bf16 %v248_v57  ;;  %v196_v9 = vunpack.c.h.bf16 %v241_v52 }
  0x10   :  { %157 = vst [vmem:[%s420_s4 + $0x20] sm:$0xff] %v141_v54  ;;  %v128_v10 = vadd.f32 %v220_v50, %v80_v0  ;;  %v63_v11 = vmul.f32 %v284_v1, %v195_v4  ;;  %v228_v12 = vunpack.c.h.bf16 %v248_v57  ;;  %v199_v13 = vunpack.c.l.bf16 %v242_v62 }
  0x11   :  { %158 = vst [vmem:[%s420_s4 + $0x28] sm:$0xff] %v142_v58  ;;  %v129_v14 = vadd.f32 %v223_v60, %v81_v6  ;;  %v82_v15 = vadd.f32 %v289_v3, %v62_v7  ;;  %v64_v16 = vmul.f32 %v284_v1, %v196_v9  ;;  %v231_v17 = vunpack.c.l.bf16 %v249_v5 }
  0x12   :  { %159 = vst [vmem:[%s420_s4 + $0x30] sm:$0xff] %v143_v63  ;;  %v144_v19 = vmax.f32 %v128_v10, 0.0  ;;  %v83_v20 = vadd.f32 %v289_v3, %v63_v11  ;;  %v65_v21 = vmul.f32 %v284_v1, %v199_v13  ;;  %v200_v22 = vunpack.c.h.bf16 %v242_v62 }
  0x13   :  { %v145_v24 = vmax.f32 %v129_v14, 0.0  ;;  %v130_v25 = vadd.f32 %v224_v2, %v82_v15  ;;  %v84_v26 = vadd.f32 %v289_v3, %v64_v16  ;;  %v232_v27 = vunpack.c.h.bf16 %v249_v5 }
  0x14   :  { %160 = vst [vmem:[%s420_s4 + $0x38] sm:$0xff] %v144_v19  ;;  %v131_v28 = vadd.f32 %v227_v8, %v83_v20  ;;  %v85_v29 = vadd.f32 %v289_v3, %v65_v21  ;;  %v66_v30 = vmul.f32 %v284_v1, %v200_v22  ;;  %v203_v31 = vunpack.c.l.bf16 %v243_v18 }
  0x15   :  { %161 = vst [vmem:[%s420_s4 + $0x40] sm:$0xff] %v145_v24  ;;  %v146_v32 = vmax.f32 %v130_v25, 0.0  ;;  %v132_v33 = vadd.f32 %v228_v12, %v84_v26  ;;  %v235_v34 = vunpack.c.l.bf16 %v250_v23  ;;  %v204_v35 = vunpack.c.h.bf16 %v243_v18 }
  0x16   :  { %v147_v36 = vmax.f32 %v131_v28, 0.0  ;;  %v133_v37 = vadd.f32 %v231_v17, %v85_v29  ;;  %v86_v38 = vadd.f32 %v289_v3, %v66_v30  ;;  %v67_v39 = vmul.f32 %v284_v1, %v203_v31 }
  0x17   :  { %162 = vst [vmem:[%s420_s4 + $0x48] sm:$0xff] %v146_v32  ;;  %v148_v40 = vmax.f32 %v132_v33, 0.0  ;;  %v68_v41 = vmul.f32 %v284_v1, %v204_v35  ;;  %v236_v42 = vunpack.c.h.bf16 %v250_v23 }
  0x18   :  { %163 = vst [vmem:[%s420_s4 + $0x50] sm:$0xff] %v147_v36  ;;  %v149_v43 = vmax.f32 %v133_v37, 0.0  ;;  %v134_v44 = vadd.f32 %v232_v27, %v86_v38  ;;  %v87_v45 = vadd.f32 %v289_v3, %v67_v39 }
  0x19   :  { %164 = vst [vmem:[%s420_s4 + $0x58] sm:$0xff] %v148_v40  ;;  %v88_v46 = vadd.f32 %v289_v3, %v68_v41 }
  0x1a   :  { %165 = vst [vmem:[%s420_s4 + $0x60] sm:$0xff] %v149_v43  ;;  %v150_v1 = vmax.f32 %v134_v44, 0.0  ;;  %v135_v47 = vadd.f32 %v235_v34, %v87_v45 }
  0x1b   :  { %v136_v48 = vadd.f32 %v236_v42, %v88_v46 }
  0x1c   :  { %166 = vst [vmem:[%s420_s4 + $0x68] sm:$0xff] %v150_v1  ;;  %v151_v49 = vmax.f32 %v135_v47, 0.0 }
  0x1d   :  { %v152_v50 = vmax.f32 %v136_v48, 0.0 }
  0x1e   :  { %167 = vst [vmem:[%s420_s4 + $0x70] sm:$0xff] %v151_v49 }
  0x1f   :  { %168 = vst [vmem:[%s420_s4 + $0x78] sm:$0xff] %v152_v50 }

// kernel: basic_block_forward.10
= control target key start
LH: loop header
LB: loop body
LE: loop exit
PB: predicated region body
PF: predicated region fallthrough
CT: control target
= control target key end

     0   :  { %s3239_s1 = inlined_call_operand.vmem [shape: bf16[1152,128], index: 1, kind: input, shape index: {}]   ;;  %s3240_s0 = inlined_call_operand.vmem [shape: bf16[128,1152], index: 0, kind: input, shape index: {}]   ;;  %s3241_s2 = inlined_call_operand.vmem [shape: bf16[128,128], index: 2, kind: output, shape index: {0}]   ;;  %s3242_s3 = inlined_call_operand.vmem [shape: f32[8,128], index: 3, kind: output, shape index: {1}]   ;;  %s3243_s4 = inlined_call_operand.vmem [shape: f32[8,128], index: 4, kind: output, shape index: {2}]  }
   0x1   :  { %v2315_v0 = vld [vmem:[%s3239_s1 + $0x38] sm:$0xff]  ;;  %v2314_v1 = vld [vmem:[%s3239_s1 + $0x30] sm:$0xff]  ;;  %v2313_v2 = vld [vmem:[%s3239_s1 + $0x28] sm:$0xff] }
   0x2   :  { %2427 = vmatpush.bf16.msra.mxu1 %v2315_v0  ;;  %2428 = vmatpush.bf16.msra.mxu2 %v2315_v0  ;;  %v2312_v3 = vld [vmem:[%s3239_s1 + $0x20] sm:$0xff]  ;;  %v2311_v4 = vld [vmem:[%s3239_s1 + $0x18] sm:$0xff]  ;;  %v2310_v5 = vld [vmem:[%s3239_s1 + $0x10] sm:$0xff] }
   0x3   :  { %2429 = vmatpush.bf16.msra.mxu3 %v2315_v0  ;;  %1083 = vmatpush.bf16.msra.mxu0 %v2315_v0  ;;  %v2309_v6 = vld [vmem:[%s3239_s1 + $0x8] sm:$0xff]  ;;  %v2308_v7 = vld [vmem:[%s3239_s1] sm:$0xff]  ;;  %v1734_v8 = vld [vmem:[%s3240_s0 + $0x90] sm:$0xf] }
   0x4   :  { %v2258_v9 = vld [vmem:[%s3240_s0 + $0xb0] sm:$0xf0]  ;;  %v1806_v10 = vld [vmem:[%s3240_s0 + $0x120] sm:$0xf]  ;;  %v2276_v11 = vld [vmem:[%s3240_s0 + $0x140] sm:$0xf0] }
   0x5   :  { %v1878_v12 = vld [vmem:[%s3240_s0 + $0x1b0] sm:$0xf]  ;;  %v2294_v13 = vld [vmem:[%s3240_s0 + $0x1d0] sm:$0xf0]  ;;  %v1662_v14 = vld [vmem:[%s3240_s0] sm:$0xf]  ;;  %v1735_v18 = vor.u32 %v2258_v9, %v1734_v8  ;;  %v1807_v19 = vor.u32 %v2276_v11, %v1806_v10 }
   0x6   :  { %2430 = vmatpush.bf16.msra.mxu1 %v2314_v1  ;;  %2431 = vmatpush.bf16.msra.mxu2 %v2314_v1  ;;  %v2240_v15 = vld [vmem:[%s3240_s0 + $0x20] sm:$0xf0]  ;;  %v2331_v16 = vld [vmem:[%s3239_s1 + $0xb8] sm:$0xff]  ;;  %v1879_v20 = vor.u32 %v2294_v13, %v1878_v12  ;;  %v2330_v24 = vld [vmem:[%s3239_s1 + $0xb0] sm:$0xff] }
   0x7   :  { %2432 = vmatpush.bf16.msra.mxu3 %v2314_v1  ;;  %1084 = vmatpush.bf16.msra.mxu0 %v2314_v1  ;;  %v2323_v17 = vld [vmem:[%s3239_s1 + $0x78] sm:$0xff]  ;;  %v1663_v21 = vor.u32 %v2240_v15, %v1662_v14  ;;  %v2322_v25 = vld [vmem:[%s3239_s1 + $0x70] sm:$0xff]  ;;  %v2329_v28 = vld [vmem:[%s3239_s1 + $0xa8] sm:$0xff] }
   0x8   :  { %v2339_v22 = vld [vmem:[%s3239_s1 + $0xf8] sm:$0xff]  ;;  %v2338_v26 = vld [vmem:[%s3239_s1 + $0xf0] sm:$0xff]  ;;  %v2321_v29 = vld [vmem:[%s3239_s1 + $0x68] sm:$0xff] }
   0x9   :  { %v2347_v23 = vld [vmem:[%s3239_s1 + $0x138] sm:$0xff]  ;;  %v2346_v27 = vld [vmem:[%s3239_s1 + $0x130] sm:$0xff]  ;;  %v2337_v30 = vld [vmem:[%s3239_s1 + $0xe8] sm:$0xff] }
   0xa   :  { %2433 = vmatpush.bf16.msra.mxu1 %v2313_v2  ;;  %2434 = vmatpush.bf16.msra.mxu2 %v2313_v2  ;;  %v2345_v31 = vld [vmem:[%s3239_s1 + $0x128] sm:$0xff]  ;;  %v2328_v32 = vld [vmem:[%s3239_s1 + $0xa0] sm:$0xff]  ;;  %v1770_v36 = vld [vmem:[%s3240_s0 + $0xd8] sm:$0xf] }
   0xb   :  { %2435 = vmatpush.bf16.msra.mxu3 %v2313_v2  ;;  %1085 = vmatpush.bf16.msra.mxu0 %v2313_v2  ;;  %v2320_v33 = vld [vmem:[%s3239_s1 + $0x60] sm:$0xff]  ;;  %v2267_v37 = vld [vmem:[%s3240_s0 + $0xf8] sm:$0xf0]  ;;  %v1842_v38 = vld [vmem:[%s3240_s0 + $0x168] sm:$0xf] }
   0xc   :  { %v2336_v34 = vld [vmem:[%s3239_s1 + $0xe0] sm:$0xff]  ;;  %v2285_v39 = vld [vmem:[%s3240_s0 + $0x188] sm:$0xf0]  ;;  %v1914_v40 = vld [vmem:[%s3240_s0 + $0x1f8] sm:$0xf]  ;;  %v1771_v46 = vor.u32 %v2267_v37, %v1770_v36 }
   0xd   :  { %v2344_v35 = vld [vmem:[%s3239_s1 + $0x120] sm:$0xff]  ;;  %v2303_v41 = vld [vmem:[%s3240_s0 + $0x218] sm:$0xf0]  ;;  %v1698_v42 = vld [vmem:[%s3240_s0 + $0x48] sm:$0xf]  ;;  %v1843_v47 = vor.u32 %v2285_v39, %v1842_v38 }
   0xe   :  { %2436 = vmatpush.bf16.msra.mxu1 %v2312_v3  ;;  %2437 = vmatpush.bf16.msra.mxu2 %v2312_v3  ;;  %v2249_v43 = vld [vmem:[%s3240_s0 + $0x68] sm:$0xf0]  ;;  %v2327_v44 = vld [vmem:[%s3239_s1 + $0x98] sm:$0xff]  ;;  %v1915_v48 = vor.u32 %v2303_v41, %v1914_v40  ;;  %v2326_v52 = vld [vmem:[%s3239_s1 + $0x90] sm:$0xff] }
   0xf   :  { %2438 = vmatpush.bf16.msra.mxu3 %v2312_v3  ;;  %1086 = vmatpush.bf16.msra.mxu0 %v2312_v3  ;;  %v2319_v45 = vld [vmem:[%s3239_s1 + $0x58] sm:$0xff]  ;;  %v1699_v49 = vor.u32 %v2249_v43, %v1698_v42  ;;  %v2318_v53 = vld [vmem:[%s3239_s1 + $0x50] sm:$0xff]  ;;  %v2325_v56 = vld [vmem:[%s3239_s1 + $0x88] sm:$0xff] }
  0x10   :  { %v2335_v50 = vld [vmem:[%s3239_s1 + $0xd8] sm:$0xff]  ;;  %v2334_v54 = vld [vmem:[%s3239_s1 + $0xd0] sm:$0xff]  ;;  %v2317_v57 = vld [vmem:[%s3239_s1 + $0x48] sm:$0xff] }
  0x11   :  { %v2343_v51 = vld [vmem:[%s3239_s1 + $0x118] sm:$0xff]  ;;  %v2342_v55 = vld [vmem:[%s3239_s1 + $0x110] sm:$0xff]  ;;  %v2333_v58 = vld [vmem:[%s3239_s1 + $0xc8] sm:$0xff] }
  0x12   :  { %2439 = vmatpush.bf16.msra.mxu1 %v2311_v4  ;;  %2440 = vmatpush.bf16.msra.mxu2 %v2311_v4  ;;  %v2341_v59 = vld [vmem:[%s3239_s1 + $0x108] sm:$0xff]  ;;  %v2324_v60 = vld [vmem:[%s3239_s1 + $0x80] sm:$0xff]  ;;  %v2363_v2 = vld [vmem:[%s3239_s1 + $0x1b8] sm:$0xff] }
  0x13   :  { %2441 = vmatpush.bf16.msra.mxu3 %v2311_v4  ;;  %1087 = vmatpush.bf16.msra.mxu0 %v2311_v4  ;;  %v2316_v61 = vld [vmem:[%s3239_s1 + $0x40] sm:$0xff]  ;;  %v1664_v1 = vld [vmem:[%s3240_s0 + $0x24] sm:$0xf0]  ;;  %v2355_v3 = vld [vmem:[%s3239_s1 + $0x178] sm:$0xff] }
  0x14   :  { %v2236_v62 = vld [vmem:[%s3240_s0 + $0x4] sm:$0xf]  ;;  %v1670_v4 = vld [vmem:[%s3240_s0 + $0x8] sm:$0xf]  ;;  %v1678_v8 = vld [vmem:[%s3240_s0 + $0x10] sm:$0xf] }
  0x15   :  { %v2332_v63 = vld [vmem:[%s3239_s1 + $0xc0] sm:$0xff]  ;;  %v2242_v9 = vld [vmem:[%s3240_s0 + $0x30] sm:$0xf0]  ;;  %v2371_v10 = vld [vmem:[%s3239_s1 + $0x1f8] sm:$0xff]  ;;  %v1667_v12 = vor.u32 %v2236_v62, %v1664_v1 }
  0x16   :  { %2442 = vmatpush.bf16.msra.mxu1 %v2310_v5  ;;  %2443 = vmatpush.bf16.msra.mxu2 %v2310_v5  ;;  %v2340_v0 = vld [vmem:[%s3239_s1 + $0x100] sm:$0xff]  ;;  %v2379_v11 = vld [vmem:[%s3239_s1 + $0x238] sm:$0xff]  ;;  %v1679_v15 = vor.u32 %v2242_v9, %v1678_v8  ;;  %v2254_v40 = vld [vmem:[%s3240_s0 + $0x94] sm:$0xf] }
  0x17   :  { %2444 = vmatpush.bf16.msra.mxu3 %v2310_v5  ;;  %1088 = vmatpush.bf16.msra.mxu0 %v2310_v5  ;;  %v2241_v5 = vld [vmem:[%s3240_s0 + $0x28] sm:$0xf0]  ;;  %v2360_v36 = vld [vmem:[%s3239_s1 + $0x1a0] sm:$0xff]  ;;  %v1736_v41 = vld [vmem:[%s3240_s0 + $0xb4] sm:$0xf0] }
  0x18   :  { %v1671_v13 = vor.u32 %v2241_v5, %v1670_v4  ;;  %v2368_v37 = vld [vmem:[%s3239_s1 + $0x1e0] sm:$0xff]  ;;  %v1742_v42 = vld [vmem:[%s3240_s0 + $0x98] sm:$0xf]  ;;  %v2259_v43 = vld [vmem:[%s3240_s0 + $0xb8] sm:$0xf0] }
  0x19   :  { %v2352_v38 = vld [vmem:[%s3239_s1 + $0x160] sm:$0xff]  ;;  %v1786_v62 = vld [vmem:[%s3240_s0 + $0xe8] sm:$0xf]  ;;  %v2358_v4 = vld [vmem:[%s3239_s1 + $0x190] sm:$0xff] }
  0x1a   :  { %2445 = vmatpush.bf16.msra.mxu1 %v2309_v6  ;;  %2446 = vmatpush.bf16.msra.mxu2 %v2309_v6  ;;  %v2376_v39 = vld [vmem:[%s3239_s1 + $0x220] sm:$0xff]  ;;  %v2366_v5 = vld [vmem:[%s3239_s1 + $0x1d0] sm:$0xff]  ;;  %v1808_v9 = vld [vmem:[%s3240_s0 + $0x144] sm:$0xf0] }
  0x1b   :  { %2447 = vmatpush.bf16.msra.mxu3 %v2309_v6  ;;  %1089 = vmatpush.bf16.msra.mxu0 %v2309_v6  ;;  %v2237_v6 = vld [vmem:[%s3240_s0 + $0xc] sm:$0xf]  ;;  %v2272_v8 = vld [vmem:[%s3240_s0 + $0x124] sm:$0xf] }
  0x1e   :  { %2448 = vmatpush.bf16.msra.mxu1 %v2308_v7  ;;  %2449 = vmatpush.bf16.msra.mxu2 %v2308_v7 }
  0x1f   :  { %2450 = vmatpush.bf16.msra.mxu3 %v2308_v7  ;;  %1090 = vmatpush.bf16.msra.mxu0 %v2308_v7  ;;  %v1672_v7 = vld [vmem:[%s3240_s0 + $0x2c] sm:$0xf0] }
  0x20   :  { %v1675_v14 = vor.u32 %v2237_v6, %v1672_v7  ;;  %v2350_v6 = vld [vmem:[%s3239_s1 + $0x150] sm:$0xff] }
  0x21   :  { %1101 = vmatmul.bf16.vlgmr.msra.gmra.mxu1 %v1735_v18  ;;  %1111 = vmatmul.bf16.vlgmr.msra.gmra.mxu2 %v1807_v19  ;;  %v2370_v18 = vld [vmem:[%s3239_s1 + $0x1f0] sm:$0xff] }
  0x22   :  { %1181 = vmatpush.bf16.msrb.mxu2 %v2331_v16  ;;  %1132 = vmatpush.bf16.msrb.mxu1 %v2323_v17  ;;  %v2362_v16 = vld [vmem:[%s3239_s1 + $0x1b0] sm:$0xff] }
  0x23   :  { %1121 = vmatmul.bf16.vlgmr.msra.gmra.mxu3 %v1879_v20  ;;  %1091 = vmatmul.bf16.vlgmr.msra.gmra.mxu0 %v1663_v21  ;;  %v2354_v17 = vld [vmem:[%s3239_s1 + $0x170] sm:$0xff]  ;;  %v2361_v20 = vld [vmem:[%s3239_s1 + $0x1a8] sm:$0xff] }
  0x24   :  { %1230 = vmatpush.bf16.msrb.mxu3 %v2339_v22  ;;  %1279 = vmatpush.bf16.msrb.mxu0 %v2347_v23  ;;  %v2378_v19 = vld [vmem:[%s3239_s1 + $0x230] sm:$0xff]  ;;  %v2353_v21 = vld [vmem:[%s3239_s1 + $0x168] sm:$0xff] }
  0x25   :  { %v2369_v22 = vld [vmem:[%s3239_s1 + $0x1e8] sm:$0xff]  ;;  %v2374_v7 = vld [vmem:[%s3239_s1 + $0x210] sm:$0xff] }
  0x26   :  { %1182 = vmatpush.bf16.msrb.mxu2 %v2330_v24  ;;  %1133 = vmatpush.bf16.msrb.mxu1 %v2322_v25  ;;  %v2377_v23 = vld [vmem:[%s3239_s1 + $0x228] sm:$0xff]  ;;  %v1700_v25 = vld [vmem:[%s3240_s0 + $0x6c] sm:$0xf0] }
  0x27   :  { %v2245_v24 = vld [vmem:[%s3240_s0 + $0x4c] sm:$0xf] }
  0x28   :  { %1231 = vmatpush.bf16.msrb.mxu3 %v2338_v26  ;;  %1280 = vmatpush.bf16.msrb.mxu0 %v2346_v27  ;;  %v1706_v26 = vld [vmem:[%s3240_s0 + $0x50] sm:$0xf]  ;;  %v2250_v27 = vld [vmem:[%s3240_s0 + $0x70] sm:$0xf0] }
  0x2a   :  { %1183 = vmatpush.bf16.msrb.mxu2 %v2329_v28  ;;  %1134 = vmatpush.bf16.msrb.mxu1 %v2321_v29  ;;  %v2246_v28 = vld [vmem:[%s3240_s0 + $0x54] sm:$0xf]  ;;  %v1708_v29 = vld [vmem:[%s3240_s0 + $0x74] sm:$0xf0] }
  0x2c   :  { %1232 = vmatpush.bf16.msrb.mxu3 %v2337_v30  ;;  %1281 = vmatpush.bf16.msrb.mxu0 %v2345_v31  ;;  %v1714_v30 = vld [vmem:[%s3240_s0 + $0x58] sm:$0xf]  ;;  %v2251_v31 = vld [vmem:[%s3240_s0 + $0x78] sm:$0xf0] }
  0x2e   :  { %1184 = vmatpush.bf16.msrb.mxu2 %v2328_v32  ;;  %1135 = vmatpush.bf16.msrb.mxu1 %v2320_v33  ;;  %v1703_v32 = vor.u32 %v2245_v24, %v1700_v25  ;;  %v1707_v33 = vor.u32 %v2250_v27, %v1706_v26  ;;  %v2281_v24 = vld [vmem:[%s3240_s0 + $0x16c] sm:$0xf]  ;;  %v1844_v25 = vld [vmem:[%s3240_s0 + $0x18c] sm:$0xf0]  ;;  %v2286_v27 = vld [vmem:[%s3240_s0 + $0x190] sm:$0xf0] }
  0x2f   :  { %v1850_v26 = vld [vmem:[%s3240_s0 + $0x170] sm:$0xf] }
  0x30   :  { %1233 = vmatpush.bf16.msrb.mxu3 %v2336_v34  ;;  %1282 = vmatpush.bf16.msrb.mxu0 %v2344_v35  ;;  %v1711_v34 = vor.u32 %v2246_v28, %v1708_v29  ;;  %v1715_v35 = vor.u32 %v2251_v31, %v1714_v30  ;;  %v2282_v28 = vld [vmem:[%s3240_s0 + $0x174] sm:$0xf]  ;;  %v1852_v29 = vld [vmem:[%s3240_s0 + $0x194] sm:$0xf0]  ;;  %v2287_v31 = vld [vmem:[%s3240_s0 + $0x198] sm:$0xf0] }
  0x31   :  { %1106 = vmatmul.bf16.gmra.mxu1 %v1771_v46  ;;  %1116 = vmatmul.bf16.gmra.mxu2 %v1843_v47  ;;  %v1750_v46 = vld [vmem:[%s3240_s0 + $0xa0] sm:$0xf]  ;;  %v2260_v47 = vld [vmem:[%s3240_s0 + $0xc0] sm:$0xf0]  ;;  %v1858_v30 = vld [vmem:[%s3240_s0 + $0x178] sm:$0xf] }
  0x32   :  { %1185 = vmatpush.bf16.msrb.mxu2 %v2327_v44  ;;  %1136 = vmatpush.bf16.msrb.mxu1 %v2319_v45  ;;  %v2255_v44 = vld [vmem:[%s3240_s0 + $0x9c] sm:$0xf]  ;;  %v1744_v45 = vld [vmem:[%s3240_s0 + $0xbc] sm:$0xf0] }
  0x33   :  { %1126 = vmatmul.bf16.gmra.mxu3 %v1915_v48  ;;  %1096 = vmatmul.bf16.gmra.mxu0 %v1699_v49  ;;  %v1739_v48 = vor.u32 %v2254_v40, %v1736_v41  ;;  %v1743_v49 = vor.u32 %v2259_v43, %v1742_v42  ;;  %v2290_v40 = vld [vmem:[%s3240_s0 + $0x1b4] sm:$0xf]  ;;  %v1880_v41 = vld [vmem:[%s3240_s0 + $0x1d4] sm:$0xf0]  ;;  %v2295_v43 = vld [vmem:[%s3240_s0 + $0x1d8] sm:$0xf0] }
  0x34   :  { %1234 = vmatpush.bf16.msrb.mxu3 %v2335_v50  ;;  %1283 = vmatpush.bf16.msrb.mxu0 %v2343_v51  ;;  %v1747_v50 = vor.u32 %v2255_v44, %v1744_v45  ;;  %v1751_v51 = vor.u32 %v2260_v47, %v1750_v46  ;;  %v1886_v42 = vld [vmem:[%s3240_s0 + $0x1b8] sm:$0xf]  ;;  %v2291_v44 = vld [vmem:[%s3240_s0 + $0x1bc] sm:$0xf]  ;;  %v1888_v45 = vld [vmem:[%s3240_s0 + $0x1dc] sm:$0xf0] }
  0x35   :  { %v1894_v46 = vld [vmem:[%s3240_s0 + $0x1c0] sm:$0xf]  ;;  %v2296_v47 = vld [vmem:[%s3240_s0 + $0x1e0] sm:$0xf0] }
  0x36   :  { %1186 = vmatpush.bf16.msrb.mxu2 %v2326_v52  ;;  %1137 = vmatpush.bf16.msrb.mxu1 %v2318_v53  ;;  %v2359_v52 = vld [vmem:[%s3239_s1 + $0x198] sm:$0xff] }
  0x37   :  { %v2367_v53 = vld [vmem:[%s3239_s1 + $0x1d8] sm:$0xff] }
  0x38   :  { %1235 = vmatpush.bf16.msrb.mxu3 %v2334_v54  ;;  %1284 = vmatpush.bf16.msrb.mxu0 %v2342_v55  ;;  %v2351_v54 = vld [vmem:[%s3239_s1 + $0x158] sm:$0xff] }
  0x39   :  { %v2375_v55 = vld [vmem:[%s3239_s1 + $0x218] sm:$0xff] }
  0x3a   :  { %1187 = vmatpush.bf16.msrb.mxu2 %v2325_v56  ;;  %1138 = vmatpush.bf16.msrb.mxu1 %v2317_v57  ;;  %v2263_v56 = vld [vmem:[%s3240_s0 + $0xdc] sm:$0xf]  ;;  %v1772_v57 = vld [vmem:[%s3240_s0 + $0xfc] sm:$0xf0] }
  0x3c   :  { %1236 = vmatpush.bf16.msrb.mxu3 %v2333_v58  ;;  %1285 = vmatpush.bf16.msrb.mxu0 %v2341_v59  ;;  %v1778_v58 = vld [vmem:[%s3240_s0 + $0xe0] sm:$0xf]  ;;  %v2268_v59 = vld [vmem:[%s3240_s0 + $0x100] sm:$0xf0] }
  0x3d   :  { %v1779_v1 = vor.u32 %v2268_v59, %v1778_v58  ;;  %v2299_v58 = vld [vmem:[%s3240_s0 + $0x1fc] sm:$0xf]  ;;  %v1916_v59 = vld [vmem:[%s3240_s0 + $0x21c] sm:$0xf0] }
  0x3e   :  { %1188 = vmatpush.bf16.msrb.mxu2 %v2324_v60  ;;  %1139 = vmatpush.bf16.msrb.mxu1 %v2316_v61  ;;  %v2264_v60 = vld [vmem:[%s3240_s0 + $0xe4] sm:$0xf]  ;;  %v1780_v61 = vld [vmem:[%s3240_s0 + $0x104] sm:$0xf0] }
  0x40   :  { %1237 = vmatpush.bf16.msrb.mxu3 %v2332_v63  ;;  %1286 = vmatpush.bf16.msrb.mxu0 %v2340_v0  ;;  %v2269_v63 = vld [vmem:[%s3240_s0 + $0x108] sm:$0xf0]  ;;  %v1775_v0 = vor.u32 %v2263_v56, %v1772_v57 }
  0x41   :  { %1140 = vmatmul.bf16.vlgmr.msrb.gmra.mxu1 %v1667_v12  ;;  %1189 = vmatmul.bf16.vlgmr.msrb.gmra.mxu2 %v1671_v13  ;;  %v2273_v12 = vld [vmem:[%s3240_s0 + $0x12c] sm:$0xf]  ;;  %v1816_v13 = vld [vmem:[%s3240_s0 + $0x14c] sm:$0xf0] }
  0x42   :  { %1377 = vmatpush.bf16.msra.mxu2 %v2363_v2  ;;  %1328 = vmatpush.bf16.msra.mxu1 %v2355_v3  ;;  %v1783_v2 = vor.u32 %v2264_v60, %v1780_v61  ;;  %v1787_v3 = vor.u32 %v2269_v63, %v1786_v62  ;;  %v1922_v60 = vld [vmem:[%s3240_s0 + $0x200] sm:$0xf]  ;;  %v2304_v61 = vld [vmem:[%s3240_s0 + $0x220] sm:$0xf0]  ;;  %v1924_v63 = vld [vmem:[%s3240_s0 + $0x224] sm:$0xf0] }
  0x43   :  { %1238 = vmatmul.bf16.vlgmr.msrb.gmra.mxu3 %v1675_v14  ;;  %1287 = vmatmul.bf16.vlgmr.msrb.gmra.mxu0 %v1679_v15  ;;  %v1822_v14 = vld [vmem:[%s3240_s0 + $0x130] sm:$0xf]  ;;  %v2278_v15 = vld [vmem:[%s3240_s0 + $0x150] sm:$0xf0]  ;;  %v2300_v62 = vld [vmem:[%s3240_s0 + $0x204] sm:$0xf] }
  0x44   :  { %1426 = vmatpush.bf16.msra.mxu3 %v2371_v10  ;;  %1475 = vmatpush.bf16.msra.mxu0 %v2379_v11  ;;  %v1814_v10 = vld [vmem:[%s3240_s0 + $0x128] sm:$0xf]  ;;  %v2277_v11 = vld [vmem:[%s3240_s0 + $0x148] sm:$0xf0] }
  0x46   :  { %1378 = vmatpush.bf16.msra.mxu2 %v2362_v16  ;;  %1329 = vmatpush.bf16.msra.mxu1 %v2354_v17  ;;  %v1811_v16 = vor.u32 %v2272_v8, %v1808_v9  ;;  %v1815_v17 = vor.u32 %v2277_v11, %v1814_v10 }
  0x48   :  { %1427 = vmatpush.bf16.msra.mxu3 %v2370_v18  ;;  %1476 = vmatpush.bf16.msra.mxu0 %v2378_v19  ;;  %v1819_v18 = vor.u32 %v2273_v12, %v1816_v13  ;;  %v1823_v19 = vor.u32 %v2278_v15, %v1822_v14  ;;  %v2238_v14 = vld [vmem:[%s3240_s0 + $0x14] sm:$0xf]  ;;  %v1680_v15 = vld [vmem:[%s3240_s0 + $0x34] sm:$0xf0] }
  0x4a   :  { %1379 = vmatpush.bf16.msra.mxu2 %v2361_v20  ;;  %1330 = vmatpush.bf16.msra.mxu1 %v2353_v21  ;;  %v2357_v20 = vld [vmem:[%s3239_s1 + $0x188] sm:$0xff] }
  0x4b   :  { %v2365_v21 = vld [vmem:[%s3239_s1 + $0x1c8] sm:$0xff] }
  0x4c   :  { %1428 = vmatpush.bf16.msra.mxu3 %v2369_v22  ;;  %1477 = vmatpush.bf16.msra.mxu0 %v2377_v23  ;;  %v2349_v22 = vld [vmem:[%s3239_s1 + $0x148] sm:$0xff] }
  0x4d   :  { %v2373_v23 = vld [vmem:[%s3239_s1 + $0x208] sm:$0xff] }
  0x4e   :  { %1380 = vmatpush.bf16.msra.mxu2 %v2360_v36  ;;  %1331 = vmatpush.bf16.msra.mxu1 %v2352_v38  ;;  %v2356_v36 = vld [vmem:[%s3239_s1 + $0x180] sm:$0xff] }
  0x4f   :  { %v2348_v38 = vld [vmem:[%s3239_s1 + $0x140] sm:$0xff] }
  0x50   :  { %1429 = vmatpush.bf16.msra.mxu3 %v2368_v37  ;;  %1478 = vmatpush.bf16.msra.mxu0 %v2376_v39  ;;  %v2364_v37 = vld [vmem:[%s3239_s1 + $0x1c0] sm:$0xff] }
  0x51   :  { %1145 = vmatmul.bf16.gmra.mxu1 %v1703_v32  ;;  %1194 = vmatmul.bf16.gmra.mxu2 %v1707_v33  ;;  %v1847_v32 = vor.u32 %v2281_v24, %v1844_v25  ;;  %v1851_v33 = vor.u32 %v2286_v27, %v1850_v26  ;;  %v2372_v39 = vld [vmem:[%s3239_s1 + $0x200] sm:$0xff]  ;;  %v1683_v24 = vor.u32 %v2238_v14, %v1680_v15 }
  0x52   :  { %1381 = vmatpush.bf16.msra.mxu2 %v2359_v52  ;;  %1332 = vmatpush.bf16.msra.mxu1 %v2351_v54  ;;  %v1895_v52 = vor.u32 %v2296_v47, %v1894_v46  ;;  %v2253_v46 = vld [vmem:[%s3240_s0 + $0x88] sm:$0xf0]  ;;  %v2256_v14 = vld [vmem:[%s3240_s0 + $0xa4] sm:$0xf] }
  0x53   :  { %1243 = vmatmul.bf16.gmra.mxu3 %v1711_v34  ;;  %1292 = vmatmul.bf16.gmra.mxu0 %v1715_v35  ;;  %v1855_v34 = vor.u32 %v2282_v28, %v1852_v29  ;;  %v1859_v35 = vor.u32 %v2287_v31, %v1858_v30 }
  0x54   :  { %1430 = vmatpush.bf16.msra.mxu3 %v2367_v53  ;;  %1479 = vmatpush.bf16.msra.mxu0 %v2375_v55 }
  0x56   :  { %1382 = vmatpush.bf16.msra.mxu2 %v2358_v4  ;;  %1333 = vmatpush.bf16.msra.mxu1 %v2350_v6  ;;  %v1919_v4 = vor.u32 %v2299_v58, %v1916_v59 }
  0x58   :  { %1431 = vmatpush.bf16.msra.mxu3 %v2366_v5  ;;  %1480 = vmatpush.bf16.msra.mxu0 %v2374_v7  ;;  %v1923_v5 = vor.u32 %v2304_v61, %v1922_v60  ;;  %v1927_v7 = vor.u32 %v2300_v62, %v1924_v63 }
  0x5a   :  { %1383 = vmatpush.bf16.msra.mxu2 %v2357_v20  ;;  %1334 = vmatpush.bf16.msra.mxu1 %v2349_v22  ;;  %v1694_v20 = vld [vmem:[%s3240_s0 + $0x20] sm:$0xf] }
  0x5c   :  { %1432 = vmatpush.bf16.msra.mxu3 %v2365_v21  ;;  %1481 = vmatpush.bf16.msra.mxu0 %v2373_v23  ;;  %v2244_v21 = vld [vmem:[%s3240_s0 + $0x40] sm:$0xf0] }
  0x5d   :  { %v1695_v28 = vor.u32 %v2244_v21, %v1694_v20  ;;  %v2262_v20 = vld [vmem:[%s3240_s0 + $0xd0] sm:$0xf0] }
  0x5e   :  { %1384 = vmatpush.bf16.msra.mxu2 %v2356_v36  ;;  %1335 = vmatpush.bf16.msra.mxu1 %v2348_v38  ;;  %v2247_v38 = vld [vmem:[%s3240_s0 + $0x5c] sm:$0xf] }
  0x60   :  { %1433 = vmatpush.bf16.msra.mxu3 %v2364_v37  ;;  %1482 = vmatpush.bf16.msra.mxu0 %v2372_v39  ;;  %v1716_v39 = vld [vmem:[%s3240_s0 + $0x7c] sm:$0xf0] }
  0x61   :  { %1150 = vmatmul.bf16.gmra.mxu1 %v1739_v48  ;;  %1199 = vmatmul.bf16.gmra.mxu2 %v1743_v49  ;;  %v1883_v48 = vor.u32 %v2290_v40, %v1880_v41  ;;  %v1887_v49 = vor.u32 %v2295_v43, %v1886_v42  ;;  %v1722_v41 = vld [vmem:[%s3240_s0 + $0x60] sm:$0xf]  ;;  %v2252_v42 = vld [vmem:[%s3240_s0 + $0x80] sm:$0xf0] }
  0x62   :  { %v2248_v43 = vld [vmem:[%s3240_s0 + $0x64] sm:$0xf] }
  0x63   :  { %1248 = vmatmul.bf16.gmra.mxu3 %v1747_v50  ;;  %1297 = vmatmul.bf16.gmra.mxu0 %v1751_v51  ;;  %v1891_v51 = vor.u32 %v2291_v44, %v1888_v45  ;;  %v1724_v44 = vld [vmem:[%s3240_s0 + $0x84] sm:$0xf0] }
  0x64   :  { %v1730_v45 = vld [vmem:[%s3240_s0 + $0x68] sm:$0xf] }
  0x65   :  { %v1731_v58 = vor.u32 %v2253_v46, %v1730_v45  ;;  %v1794_v45 = vld [vmem:[%s3240_s0 + $0xf0] sm:$0xf]  ;;  %v2270_v46 = vld [vmem:[%s3240_s0 + $0x110] sm:$0xf0] }
  0x71   :  { %1155 = vmatmul.bf16.gmra.mxu1 %v1775_v0  ;;  %1204 = vmatmul.bf16.gmra.mxu2 %v1779_v1  ;;  %v1930_v0 = vld [vmem:[%s3240_s0 + $0x208] sm:$0xf]  ;;  %v2305_v1 = vld [vmem:[%s3240_s0 + $0x228] sm:$0xf0] }
  0x72   :  { %v1931_v8 = vor.u32 %v2305_v1, %v1930_v0 }
  0x73   :  { %1253 = vmatmul.bf16.gmra.mxu3 %v1783_v2  ;;  %1302 = vmatmul.bf16.gmra.mxu0 %v1787_v3 }
  0x81   :  { %1160 = vmatmul.bf16.gmra.mxu1 %v1811_v16  ;;  %1209 = vmatmul.bf16.gmra.mxu2 %v1815_v17  ;;  %v1686_v16 = vld [vmem:[%s3240_s0 + $0x18] sm:$0xf]  ;;  %v2243_v17 = vld [vmem:[%s3240_s0 + $0x38] sm:$0xf0] }
  0x82   :  { %v1687_v25 = vor.u32 %v2243_v17, %v1686_v16  ;;  %v1758_v16 = vld [vmem:[%s3240_s0 + $0xa8] sm:$0xf]  ;;  %v2261_v17 = vld [vmem:[%s3240_s0 + $0xc8] sm:$0xf0] }
  0x83   :  { %1258 = vmatmul.bf16.gmra.mxu3 %v1819_v18  ;;  %1307 = vmatmul.bf16.gmra.mxu0 %v1823_v19  ;;  %v2239_v18 = vld [vmem:[%s3240_s0 + $0x1c] sm:$0xf]  ;;  %v1688_v19 = vld [vmem:[%s3240_s0 + $0x3c] sm:$0xf0] }
  0x84   :  { %v1691_v27 = vor.u32 %v2239_v18, %v1688_v19  ;;  %v1760_v18 = vld [vmem:[%s3240_s0 + $0xcc] sm:$0xf0] }
  0x85   :  { %v1766_v19 = vld [vmem:[%s3240_s0 + $0xb0] sm:$0xf] }
  0x91   :  { %1165 = vmatmul.bf16.gmra.mxu1 %v1847_v32  ;;  %1214 = vmatmul.bf16.gmra.mxu2 %v1851_v33 }
  0x93   :  { %1263 = vmatmul.bf16.gmra.mxu3 %v1855_v34  ;;  %1312 = vmatmul.bf16.gmra.mxu0 %v1859_v35 }
  0x9e   :  { %v2909_v50 = vpop.f32.mrf.mxu1 }
  0xa0   :  { %v1092_v53 = vpop.f32.mrf.mxu0 }
  0xa1   :  { %1170 = vmatmul.bf16.gmra.mxu1 %v1883_v48  ;;  %1219 = vmatmul.bf16.gmra.mxu2 %v1887_v49 }
  0xa3   :  { %1268 = vmatmul.bf16.gmra.mxu3 %v1891_v51  ;;  %1317 = vmatmul.bf16.gmra.mxu0 %v1895_v52  ;;  %v1719_v51 = vor.u32 %v2247_v38, %v1716_v39  ;;  %v1723_v52 = vor.u32 %v2252_v42, %v1722_v41 }
  0xa4   :  { %v2911_v54 = vpop.f32.mrf.mxu2 }
  0xa6   :  { %v2913_v55 = vpop.f32.mrf.mxu3  ;;  %v2915_v56 = vpop.f32.mrf.mxu1 }
  0xa8   :  { %v1094_v57 = vpop.f32.mrf.mxu0 }
  0xac   :  { %v2941_v2 = vpop.f32.mrf.mxu2 }
  0xae   :  { %v2943_v3 = vpop.f32.mrf.mxu3  ;;  %v2945_v6 = vpop.f32.mrf.mxu1 }
  0xb0   :  { %v1097_v9 = vpop.f32.mrf.mxu0 }
  0xb1   :  { %1175 = vmatmul.bf16.gmra.mxu1 %v1919_v4  ;;  %1224 = vmatmul.bf16.gmra.mxu2 %v1923_v5 }
  0xb3   :  { %1273 = vmatmul.bf16.gmra.mxu3 %v1927_v7  ;;  %1322 = vmatmul.bf16.gmra.mxu0 %v1931_v8 }
  0xb4   :  { %v2947_v10 = vpop.f32.mrf.mxu2 }
  0xb6   :  { %v2949_v11 = vpop.f32.mrf.mxu3  ;;  %v2951_v12 = vpop.f32.mrf.mxu1 }
  0xb8   :  { %v1099_v13 = vpop.f32.mrf.mxu0 }
  0xbc   :  { %v2977_v22 = vpop.f32.mrf.mxu2 }
  0xbe   :  { %v2979_v23 = vpop.f32.mrf.mxu3  ;;  %v1141_v26 = vpop.f32.mrf.mxu1 }
  0xbf   :  { %v1142_v29 = vadd.f32 %v1141_v26, %v1092_v53 }
  0xc0   :  { %v1288_v30 = vpop.f32.mrf.mxu0 }
  0xc1   :  { %1336 = vmatmul.bf16.vlgmr.msra.gmra.mxu1 %v1683_v24  ;;  %1385 = vmatmul.bf16.vlgmr.msra.gmra.mxu2 %v1687_v25 }
  0xc3   :  { %1434 = vmatmul.bf16.vlgmr.msra.gmra.mxu3 %v1691_v27  ;;  %1483 = vmatmul.bf16.vlgmr.msra.gmra.mxu0 %v1695_v28  ;;  %v1759_v27 = vor.u32 %v2261_v17, %v1758_v16 }
  0xc4   :  { %v1190_v31 = vpop.f32.mrf.mxu2 }
  0xc5   :  { %v1191_v32 = vadd.f32 %v1190_v31, %v1142_v29 }
  0xc6   :  { %v1239_v33 = vpop.f32.mrf.mxu3  ;;  %v1143_v34 = vpop.f32.mrf.mxu1 }
  0xc7   :  { %v1240_v35 = vadd.f32 %v1239_v33, %v1191_v32  ;;  %v1144_v36 = vadd.f32 %v1143_v34, %v1094_v57  ;;  %v1727_v57 = vor.u32 %v2248_v43, %v1724_v44  ;;  %v2265_v43 = vld [vmem:[%s3240_s0 + $0xec] sm:$0xf] }
  0xc8   :  { %v1290_v37 = vpop.f32.mrf.mxu0 }
  0xc9   :  { %v2987_v40 = vadd.f32 %v1288_v30, %v1240_v35  ;;  %v1767_v30 = vor.u32 %v2262_v20, %v1766_v19  ;;  %v1830_v19 = vld [vmem:[%s3240_s0 + $0x138] sm:$0xf]  ;;  %v2279_v20 = vld [vmem:[%s3240_s0 + $0x158] sm:$0xf0] }
  0xcc   :  { %v1192_v47 = vpop.f32.mrf.mxu2 }
  0xcd   :  { %v1193_v48 = vadd.f32 %v1192_v47, %v1144_v36  ;;  %v1796_v47 = vld [vmem:[%s3240_s0 + $0x114] sm:$0xf0] }
  0xce   :  { %v1241_v49 = vpop.f32.mrf.mxu3  ;;  %v1146_v53 = vpop.f32.mrf.mxu1 }
  0xcf   :  { %v1242_v59 = vadd.f32 %v1241_v49, %v1193_v48  ;;  %v1147_v60 = vadd.f32 %v1146_v53, %v1097_v9  ;;  %v1752_v9 = vld [vmem:[%s3240_s0 + $0xc4] sm:$0xf0]  ;;  %v1802_v48 = vld [vmem:[%s3240_s0 + $0xf8] sm:$0xf]  ;;  %v2271_v49 = vld [vmem:[%s3240_s0 + $0x118] sm:$0xf0] }
  0xd0   :  { %v1293_v61 = vpop.f32.mrf.mxu0  ;;  %v1755_v26 = vor.u32 %v2256_v14, %v1752_v9 }
  0xd1   :  { %1341 = vmatmul.bf16.gmra.mxu1 %v1719_v51  ;;  %1390 = vmatmul.bf16.gmra.mxu2 %v1723_v52  ;;  %v3007_v62 = vadd.f32 %v1290_v37, %v1242_v59 }
  0xd3   :  { %1439 = vmatmul.bf16.gmra.mxu3 %v1727_v57  ;;  %1488 = vmatmul.bf16.gmra.mxu0 %v1731_v58  ;;  %v1795_v58 = vor.u32 %v2270_v46, %v1794_v45  ;;  %v2283_v46 = vld [vmem:[%s3240_s0 + $0x17c] sm:$0xf] }
  0xd4   :  { %v1195_v63 = vpop.f32.mrf.mxu2 }
  0xd5   :  { %v1196_v0 = vadd.f32 %v1195_v63, %v1147_v60 }
  0xd6   :  { %v1244_v1 = vpop.f32.mrf.mxu3  ;;  %v1148_v4 = vpop.f32.mrf.mxu1 }
  0xd7   :  { %v1245_v5 = vadd.f32 %v1244_v1, %v1196_v0  ;;  %v1149_v7 = vadd.f32 %v1148_v4, %v1099_v13  ;;  %v2257_v13 = vld [vmem:[%s3240_s0 + $0xac] sm:$0xf] }
  0xd8   :  { %v1295_v8 = vpop.f32.mrf.mxu0  ;;  %v1763_v29 = vor.u32 %v2257_v13, %v1760_v18  ;;  %v2274_v13 = vld [vmem:[%s3240_s0 + $0x134] sm:$0xf] }
  0xd9   :  { %v3015_v15 = vadd.f32 %v1293_v61, %v1245_v5  ;;  %v1803_v61 = vor.u32 %v2271_v49, %v1802_v48  ;;  %v2288_v48 = vld [vmem:[%s3240_s0 + $0x1a0] sm:$0xf0] }
  0xda   :  { %v2284_v49 = vld [vmem:[%s3240_s0 + $0x184] sm:$0xf] }
  0xdc   :  { %v1197_v21 = vpop.f32.mrf.mxu2 }
  0xdd   :  { %v1198_v24 = vadd.f32 %v1197_v21, %v1149_v7  ;;  %v1832_v21 = vld [vmem:[%s3240_s0 + $0x15c] sm:$0xf0] }
  0xde   :  { %v1246_v25 = vpop.f32.mrf.mxu3  ;;  %v1151_v28 = vpop.f32.mrf.mxu1 }
  0xdf   :  { %v1247_v31 = vadd.f32 %v1246_v25, %v1198_v24  ;;  %v1152_v32 = vadd.f32 %v1151_v28, %v2909_v50  ;;  %v1788_v50 = vld [vmem:[%s3240_s0 + $0x10c] sm:$0xf0]  ;;  %v1838_v24 = vld [vmem:[%s3240_s0 + $0x140] sm:$0xf]  ;;  %v2280_v25 = vld [vmem:[%s3240_s0 + $0x160] sm:$0xf0] }
  0xe0   :  { %v1298_v33 = vpop.f32.mrf.mxu0  ;;  %v1791_v57 = vor.u32 %v2265_v43, %v1788_v50 }
  0xe1   :  { %1346 = vmatmul.bf16.gmra.mxu1 %v1755_v26  ;;  %1395 = vmatmul.bf16.gmra.mxu2 %v1759_v27  ;;  %v3036_v34 = vadd.f32 %v1295_v8, %v1247_v31 }
  0xe3   :  { %1444 = vmatmul.bf16.gmra.mxu3 %v1763_v29  ;;  %1493 = vmatmul.bf16.gmra.mxu0 %v1767_v30  ;;  %v1831_v30 = vor.u32 %v2279_v20, %v1830_v19  ;;  %v2292_v20 = vld [vmem:[%s3240_s0 + $0x1c4] sm:$0xf] }
  0xe4   :  { %v1200_v35 = vpop.f32.mrf.mxu2 }
  0xe5   :  { %v1201_v36 = vadd.f32 %v1200_v35, %v1152_v32 }
  0xe6   :  { %v1249_v37 = vpop.f32.mrf.mxu3  ;;  %v1153_v38 = vpop.f32.mrf.mxu1 }
  0xe7   :  { %v1250_v39 = vadd.f32 %v1249_v37, %v1201_v36  ;;  %v1154_v41 = vadd.f32 %v1153_v38, %v2915_v56  ;;  %v2266_v56 = vld [vmem:[%s3240_s0 + $0xf4] sm:$0xf] }
  0xe8   :  { %v1300_v42 = vpop.f32.mrf.mxu0  ;;  %v1799_v60 = vor.u32 %v2266_v56, %v1796_v47  ;;  %v1860_v56 = vld [vmem:[%s3240_s0 + $0x19c] sm:$0xf0] }
  0xe9   :  { %v3045_v44 = vadd.f32 %v1298_v33, %v1250_v39  ;;  %v1839_v33 = vor.u32 %v2280_v25, %v1838_v24  ;;  %v2297_v24 = vld [vmem:[%s3240_s0 + $0x1e8] sm:$0xf0] }
  0xea   :  { %v2293_v25 = vld [vmem:[%s3240_s0 + $0x1cc] sm:$0xf] }
  0xec   :  { %v1202_v51 = vpop.f32.mrf.mxu2 }
  0xed   :  { %v1203_v52 = vadd.f32 %v1202_v51, %v1154_v41 }
  0xee   :  { %v1251_v53 = vpop.f32.mrf.mxu3  ;;  %v1156_v59 = vpop.f32.mrf.mxu1 }
  0xef   :  { %v1252_v63 = vadd.f32 %v1251_v53, %v1203_v52  ;;  %v1157_v0 = vadd.f32 %v1156_v59, %v2945_v6  ;;  %v1824_v6 = vld [vmem:[%s3240_s0 + $0x154] sm:$0xf0]  ;;  %v1868_v52 = vld [vmem:[%s3240_s0 + $0x1a4] sm:$0xf0] }
  0xf0   :  { %v1303_v1 = vpop.f32.mrf.mxu0  ;;  %v1827_v29 = vor.u32 %v2274_v13, %v1824_v6  ;;  %v1874_v53 = vld [vmem:[%s3240_s0 + $0x188] sm:$0xf] }
  0xf1   :  { %1351 = vmatmul.bf16.gmra.mxu1 %v1791_v57  ;;  %1400 = vmatmul.bf16.gmra.mxu2 %v1795_v58  ;;  %v3066_v4 = vadd.f32 %v1300_v42, %v1252_v63  ;;  %v2289_v57 = vld [vmem:[%s3240_s0 + $0x1a8] sm:$0xf0] }
  0xf3   :  { %1449 = vmatmul.bf16.gmra.mxu3 %v1799_v60  ;;  %1498 = vmatmul.bf16.gmra.mxu0 %v1803_v61  ;;  %v1863_v61 = vor.u32 %v2283_v46, %v1860_v56 }
  0xf4   :  { %v1205_v5 = vpop.f32.mrf.mxu2 }
  0xf5   :  { %v1206_v7 = vadd.f32 %v1205_v5, %v1157_v0 }
  0xf6   :  { %v1254_v8 = vpop.f32.mrf.mxu3  ;;  %v1158_v14 = vpop.f32.mrf.mxu1 }
  0xf7   :  { %v1255_v9 = vadd.f32 %v1254_v8, %v1206_v7  ;;  %v1159_v16 = vadd.f32 %v1158_v14, %v2951_v12  ;;  %v2275_v12 = vld [vmem:[%s3240_s0 + $0x13c] sm:$0xf] }
  0xf8   :  { %v1305_v17 = vpop.f32.mrf.mxu0  ;;  %v1835_v32 = vor.u32 %v2275_v12, %v1832_v21  ;;  %v1896_v12 = vld [vmem:[%s3240_s0 + $0x1e4] sm:$0xf0] }
  0xf9   :  { %v3075_v18 = vadd.f32 %v1303_v1, %v1255_v9  ;;  %v1871_v1 = vor.u32 %v2284_v49, %v1868_v52  ;;  %v2301_v49 = vld [vmem:[%s3240_s0 + $0x20c] sm:$0xf] }
  0xfc   :  { %v1207_v26 = vpop.f32.mrf.mxu2 }
  0xfd   :  { %v1208_v27 = vadd.f32 %v1207_v26, %v1159_v16 }
  0xfe   :  { %v1256_v28 = vpop.f32.mrf.mxu3  ;;  %v1161_v31 = vpop.f32.mrf.mxu1 }
  0xff   :  { %v1257_v35 = vadd.f32 %v1256_v28, %v1208_v27  ;;  %v1162_v38 = vadd.f32 %v1161_v31, %v2911_v54  ;;  %v1866_v54 = vld [vmem:[%s3240_s0 + $0x180] sm:$0xf]  ;;  %v1904_v27 = vld [vmem:[%s3240_s0 + $0x1ec] sm:$0xf0] }
 0x100   :  { %v1308_v36 = vpop.f32.mrf.mxu0  ;;  %v1867_v63 = vor.u32 %v2288_v48, %v1866_v54  ;;  %v1910_v28 = vld [vmem:[%s3240_s0 + $0x1d0] sm:$0xf] }
 0x101   :  { %1356 = vmatmul.bf16.gmra.mxu1 %v1827_v29  ;;  %1405 = vmatmul.bf16.gmra.mxu2 %v1831_v30  ;;  %v3095_v37 = vadd.f32 %v1305_v17, %v1257_v35  ;;  %v2298_v29 = vld [vmem:[%s3240_s0 + $0x1f0] sm:$0xf0] }
 0x103   :  { %1454 = vmatmul.bf16.gmra.mxu3 %v1835_v32  ;;  %1503 = vmatmul.bf16.gmra.mxu0 %v1839_v33  ;;  %v1899_v33 = vor.u32 %v2292_v20, %v1896_v12 }
 0x104   :  { %v1210_v39 = vpop.f32.mrf.mxu2 }
 0x105   :  { %v1211_v41 = vadd.f32 %v1210_v39, %v1162_v38  ;;  %v1907_v38 = vor.u32 %v2293_v25, %v1904_v27 }
 0x106   :  { %v1259_v42 = vpop.f32.mrf.mxu3  ;;  %v1163_v43 = vpop.f32.mrf.mxu1 }
 0x107   :  { %v1260_v50 = vadd.f32 %v1259_v42, %v1211_v41  ;;  %v1164_v51 = vadd.f32 %v1163_v43, %v2941_v2  ;;  %v1875_v2 = vor.u32 %v2289_v57, %v1874_v53  ;;  %v2306_v53 = vld [vmem:[%s3240_s0 + $0x230] sm:$0xf0] }
 0x108   :  { %v1310_v45 = vpop.f32.mrf.mxu0  ;;  %v2302_v57 = vld [vmem:[%s3240_s0 + $0x214] sm:$0xf] }
 0x109   :  { %v3104_v47 = vadd.f32 %v1308_v36, %v1260_v50 }
 0x10c   :  { %v1212_v58 = vpop.f32.mrf.mxu2 }
 0x10d   :  { %v1213_v59 = vadd.f32 %v1212_v58, %v1164_v51  ;;  %v1932_v51 = vld [vmem:[%s3240_s0 + $0x22c] sm:$0xf0] }
 0x10e   :  { %v1261_v60 = vpop.f32.mrf.mxu3  ;;  %v1166_v0 = vpop.f32.mrf.mxu1 }
 0x10f   :  { %v1262_v5 = vadd.f32 %v1261_v60, %v1213_v59  ;;  %v1167_v14 = vadd.f32 %v1166_v0, %v2947_v10  ;;  %v1902_v10 = vld [vmem:[%s3240_s0 + $0x1c8] sm:$0xf]  ;;  %v1940_v59 = vld [vmem:[%s3240_s0 + $0x234] sm:$0xf0] }
 0x110   :  { %v1313_v7 = vpop.f32.mrf.mxu0  ;;  %v1903_v35 = vor.u32 %v2297_v24, %v1902_v10  ;;  %v1946_v60 = vld [vmem:[%s3240_s0 + $0x218] sm:$0xf] }
 0x111   :  { %1361 = vmatmul.bf16.gmra.mxu1 %v1863_v61  ;;  %1410 = vmatmul.bf16.gmra.mxu2 %v1867_v63  ;;  %v3125_v8 = vadd.f32 %v1310_v45, %v1262_v5  ;;  %v2307_v61 = vld [vmem:[%s3240_s0 + $0x238] sm:$0xf0] }
 0x113   :  { %1459 = vmatmul.bf16.gmra.mxu3 %v1871_v1  ;;  %1508 = vmatmul.bf16.gmra.mxu0 %v1875_v2  ;;  %v1935_v2 = vor.u32 %v2301_v49, %v1932_v51 }
 0x114   :  { %v1215_v9 = vpop.f32.mrf.mxu2 }
 0x115   :  { %v1216_v16 = vadd.f32 %v1215_v9, %v1167_v14  ;;  %v1943_v14 = vor.u32 %v2302_v57, %v1940_v59 }
 0x116   :  { %v1264_v17 = vpop.f32.mrf.mxu3  ;;  %v1168_v13 = vpop.f32.mrf.mxu1 }
 0x117   :  { %v1265_v6 = vadd.f32 %v1264_v17, %v1216_v16  ;;  %v1169_v26 = vadd.f32 %v1168_v13, %v2977_v22  ;;  %v1911_v22 = vor.u32 %v2298_v29, %v1910_v28 }
 0x118   :  { %v1315_v19 = vpop.f32.mrf.mxu0 }
 0x119   :  { %v3134_v21 = vadd.f32 %v1313_v7, %v1265_v6 }
 0x11c   :  { %v1217_v30 = vpop.f32.mrf.mxu2 }
 0x11d   :  { %v1218_v31 = vadd.f32 %v1217_v30, %v1169_v26 }
 0x11e   :  { %v1266_v32 = vpop.f32.mrf.mxu3  ;;  %v1171_v36 = vpop.f32.mrf.mxu1 }
 0x11f   :  { %v1267_v39 = vadd.f32 %v1266_v32, %v1218_v31  ;;  %v1172_v43 = vadd.f32 %v1171_v36, %v2913_v55  ;;  %v1938_v55 = vld [vmem:[%s3240_s0 + $0x210] sm:$0xf] }
 0x120   :  { %v1318_v41 = vpop.f32.mrf.mxu0  ;;  %v1939_v5 = vor.u32 %v2306_v53, %v1938_v55 }
 0x121   :  { %1366 = vmatmul.bf16.gmra.mxu1 %v1899_v33  ;;  %1415 = vmatmul.bf16.gmra.mxu2 %v1903_v35  ;;  %v3155_v42 = vadd.f32 %v1315_v19, %v1267_v39 }
 0x123   :  { %1464 = vmatmul.bf16.gmra.mxu3 %v1907_v38  ;;  %1513 = vmatmul.bf16.gmra.mxu0 %v1911_v22 }
 0x124   :  { %v1220_v50 = vpop.f32.mrf.mxu2 }
 0x125   :  { %v1221_v45 = vadd.f32 %v1220_v50, %v1172_v43 }
 0x126   :  { %v1269_v46 = vpop.f32.mrf.mxu3  ;;  %v1173_v56 = vpop.f32.mrf.mxu1 }
 0x127   :  { %v1270_v54 = vadd.f32 %v1269_v46, %v1221_v45  ;;  %v1174_v58 = vadd.f32 %v1173_v56, %v2943_v3  ;;  %v1947_v3 = vor.u32 %v2307_v61, %v1946_v60 }
 0x128   :  { %v1320_v48 = vpop.f32.mrf.mxu0 }
 0x129   :  { %v3164_v52 = vadd.f32 %v1318_v41, %v1270_v54 }
 0x12c   :  { %v1222_v63 = vpop.f32.mrf.mxu2 }
 0x12d   :  { %v1223_v0 = vadd.f32 %v1222_v63, %v1174_v58 }
 0x12e   :  { %v1271_v1 = vpop.f32.mrf.mxu3  ;;  %v1176_v7 = vpop.f32.mrf.mxu1 }
 0x12f   :  { %v1272_v9 = vadd.f32 %v1271_v1, %v1223_v0  ;;  %v1177_v13 = vadd.f32 %v1176_v7, %v2949_v11 }
 0x130   :  { %v1323_v16 = vpop.f32.mrf.mxu0 }
 0x131   :  { %1371 = vmatmul.bf16.gmra.mxu1 %v1935_v2  ;;  %1420 = vmatmul.bf16.gmra.mxu2 %v1939_v5  ;;  %v3185_v17 = vadd.f32 %v1320_v48, %v1272_v9 }
 0x133   :  { %1469 = vmatmul.bf16.gmra.mxu3 %v1943_v14  ;;  %1518 = vmatmul.bf16.gmra.mxu0 %v1947_v3 }
 0x134   :  { %v1225_v6 = vpop.f32.mrf.mxu2 }
 0x135   :  { %v1226_v19 = vadd.f32 %v1225_v6, %v1177_v13 }
 0x136   :  { %v1274_v20 = vpop.f32.mrf.mxu3  ;;  %v1178_v12 = vpop.f32.mrf.mxu1 }
 0x137   :  { %v1275_v10 = vadd.f32 %v1274_v20, %v1226_v19  ;;  %v1179_v26 = vadd.f32 %v1178_v12, %v2979_v23 }
 0x138   :  { %v1325_v24 = vpop.f32.mrf.mxu0 }
 0x139   :  { %v3188_v25 = vadd.f32 %v1323_v16, %v1275_v10 }
 0x13c   :  { %v1227_v27 = vpop.f32.mrf.mxu2 }
 0x13d   :  { %v1228_v28 = vadd.f32 %v1227_v27, %v1179_v26 }
 0x13e   :  { %v1276_v29 = vpop.f32.mrf.mxu3  ;;  %v1337_v30 = vpop.f32.mrf.mxu1 }
 0x13f   :  { %v1277_v31 = vadd.f32 %v1276_v29, %v1228_v28  ;;  %v1338_v11 = vadd.f32 %v1337_v30, %v2987_v40 }
 0x140   :  { %v1484_v32 = vpop.f32.mrf.mxu0 }
 0x141   :  { %v3191_v33 = vadd.f32 %v1325_v24, %v1277_v31 }
 0x144   :  { %v1386_v35 = vpop.f32.mrf.mxu2 }
 0x145   :  { %v1387_v38 = vadd.f32 %v1386_v35, %v1338_v11 }
 0x146   :  { %v1435_v36 = vpop.f32.mrf.mxu3  ;;  %v1339_v22 = vpop.f32.mrf.mxu1 }
 0x147   :  { %v1436_v41 = vadd.f32 %v1435_v36, %v1387_v38  ;;  %v1340_v43 = vadd.f32 %v1339_v22, %v3007_v62 }
 0x148   :  { %v1486_v39 = vpop.f32.mrf.mxu0 }
 0x149   :  { %v1485_v46 = vadd.f32 %v1484_v32, %v1436_v41 }
 0x14b   :  { %v1581_v51 = vmul.f32 %v1485_v46, %v1485_v46 }
 0x14c   :  { %v1388_v50 = vpop.f32.mrf.mxu2 }
 0x14d   :  { %v1389_v23 = vadd.f32 %v1388_v50, %v1340_v43 }
 0x14e   :  { %v1437_v45 = vpop.f32.mrf.mxu3  ;;  %v1342_v56 = vpop.f32.mrf.mxu1 }
 0x14f   :  { %v1438_v54 = vadd.f32 %v1437_v45, %v1389_v23  ;;  %v1343_v57 = vadd.f32 %v1342_v56, %v3015_v15 }
 0x150   :  { %v1489_v48 = vpop.f32.mrf.mxu0 }
 0x151   :  { %v1487_v49 = vadd.f32 %v1486_v39, %v1438_v54 }
 0x153   :  { %v2383_v55 = vpack.c.bf16 %v1487_v49, %v1485_v46  ;;  %v1557_v53 = vadd.f32 %v1487_v49, %v1485_v46  ;;  %v1582_v40 = vmul.f32 %v1487_v49, %v1487_v49 }
 0x154   :  { %v1391_v58 = vpop.f32.mrf.mxu2 }
 0x155   :  { %2384 = vst [vmem:[%s3241_s2] sm:$0xff] %v2383_v55   ;;  %v1597_v62 = vadd.f32 %v1582_v40, %v1581_v51  ;;  %v1392_v59 = vadd.f32 %v1391_v58, %v1343_v57 }
 0x156   :  { %v1440_v60 = vpop.f32.mrf.mxu3  ;;  %v1344_v61 = vpop.f32.mrf.mxu1 }
 0x157   :  { %v1441_v63 = vadd.f32 %v1440_v60, %v1392_v59  ;;  %v1345_v7 = vadd.f32 %v1344_v61, %v3036_v34 }
 0x158   :  { %v1491_v0 = vpop.f32.mrf.mxu0 }
 0x159   :  { %v1490_v1 = vadd.f32 %v1489_v48, %v1441_v63 }
 0x15b   :  { %v1558_v2 = vadd.f32 %v1557_v53, %v1490_v1  ;;  %v1583_v5 = vmul.f32 %v1490_v1, %v1490_v1 }
 0x15c   :  { %v1393_v14 = vpop.f32.mrf.mxu2 }
 0x15d   :  { %v1598_v3 = vadd.f32 %v1597_v62, %v1583_v5  ;;  %v1394_v9 = vadd.f32 %v1393_v14, %v1345_v7 }
 0x15e   :  { %v1442_v15 = vpop.f32.mrf.mxu3  ;;  %v1347_v16 = vpop.f32.mrf.mxu1 }
 0x15f   :  { %v1443_v13 = vadd.f32 %v1442_v15, %v1394_v9  ;;  %v1348_v24 = vadd.f32 %v1347_v16, %v3045_v44 }
 0x160   :  { %v1494_v6 = vpop.f32.mrf.mxu0 }
 0x161   :  { %v1492_v19 = vadd.f32 %v1491_v0, %v1443_v13 }
 0x163   :  { %v2388_v20 = vpack.c.bf16 %v1492_v19, %v1490_v1  ;;  %v1559_v12 = vadd.f32 %v1558_v2, %v1492_v19  ;;  %v1584_v10 = vmul.f32 %v1492_v19, %v1492_v19 }
 0x164   :  { %v1396_v26 = vpop.f32.mrf.mxu2 }
 0x165   :  { %2420 = vst [vmem:[%s3241_s2 + $0x8] sm:$0xff] %v2388_v20   ;;  %v1599_v27 = vadd.f32 %v1598_v3, %v1584_v10  ;;  %v1397_v34 = vadd.f32 %v1396_v26, %v1348_v24 }
 0x166   :  { %v1445_v28 = vpop.f32.mrf.mxu3  ;;  %v1349_v29 = vpop.f32.mrf.mxu1 }
 0x167   :  { %v1446_v30 = vadd.f32 %v1445_v28, %v1397_v34  ;;  %v1350_v36 = vadd.f32 %v1349_v29, %v3066_v4 }
 0x168   :  { %v1496_v31 = vpop.f32.mrf.mxu0 }
 0x169   :  { %v1495_v32 = vadd.f32 %v1494_v6, %v1446_v30 }
 0x16b   :  { %v1560_v11 = vadd.f32 %v1559_v12, %v1495_v32  ;;  %v1585_v35 = vmul.f32 %v1495_v32, %v1495_v32 }
 0x16c   :  { %v1398_v38 = vpop.f32.mrf.mxu2 }
 0x16d   :  { %v1600_v22 = vadd.f32 %v1599_v27, %v1585_v35  ;;  %v1399_v39 = vadd.f32 %v1398_v38, %v1350_v36 }
 0x16e   :  { %v1447_v44 = vpop.f32.mrf.mxu3  ;;  %v1352_v41 = vpop.f32.mrf.mxu1 }
 0x16f   :  { %v1448_v43 = vadd.f32 %v1447_v44, %v1399_v39  ;;  %v1353_v54 = vadd.f32 %v1352_v41, %v3075_v18 }
 0x170   :  { %v1499_v50 = vpop.f32.mrf.mxu0 }
 0x171   :  { %v1497_v23 = vadd.f32 %v1496_v31, %v1448_v43 }
 0x173   :  { %v2393_v45 = vpack.c.bf16 %v1497_v23, %v1495_v32  ;;  %v1561_v46 = vadd.f32 %v1560_v11, %v1497_v23  ;;  %v1586_v56 = vmul.f32 %v1497_v23, %v1497_v23 }
 0x174   :  { %v1401_v48 = vpop.f32.mrf.mxu2 }
 0x175   :  { %2421 = vst [vmem:[%s3241_s2 + $0x10] sm:$0xff] %v2393_v45   ;;  %v1601_v49 = vadd.f32 %v1600_v22, %v1586_v56  ;;  %v1402_v4 = vadd.f32 %v1401_v48, %v1353_v54 }
 0x176   :  { %v1450_v51 = vpop.f32.mrf.mxu3  ;;  %v1354_v55 = vpop.f32.mrf.mxu1 }
 0x177   :  { %v1451_v53 = vadd.f32 %v1450_v51, %v1402_v4  ;;  %v1355_v59 = vadd.f32 %v1354_v55, %v3095_v37 }
 0x178   :  { %v1501_v40 = vpop.f32.mrf.mxu0 }
 0x179   :  { %v1500_v57 = vadd.f32 %v1499_v50, %v1451_v53 }
 0x17b   :  { %v1562_v58 = vadd.f32 %v1561_v46, %v1500_v57  ;;  %v1587_v62 = vmul.f32 %v1500_v57, %v1500_v57 }
 0x17c   :  { %v1403_v60 = vpop.f32.mrf.mxu2 }
 0x17d   :  { %v1602_v61 = vadd.f32 %v1601_v49, %v1587_v62  ;;  %v1404_v63 = vadd.f32 %v1403_v60, %v1355_v59 }
 0x17e   :  { %v1452_v18 = vpop.f32.mrf.mxu3  ;;  %v1357_v0 = vpop.f32.mrf.mxu1 }
 0x17f   :  { %v1453_v1 = vadd.f32 %v1452_v18, %v1404_v63  ;;  %v1358_v9 = vadd.f32 %v1357_v0, %v3104_v47 }
 0x180   :  { %v1504_v2 = vpop.f32.mrf.mxu0 }
 0x181   :  { %v1502_v5 = vadd.f32 %v1501_v40, %v1453_v1 }
 0x183   :  { %v2398_v7 = vpack.c.bf16 %v1502_v5, %v1500_v57  ;;  %v1563_v14 = vadd.f32 %v1562_v58, %v1502_v5  ;;  %v1588_v3 = vmul.f32 %v1502_v5, %v1502_v5 }
 0x184   :  { %v1406_v15 = vpop.f32.mrf.mxu2 }
 0x185   :  { %2422 = vst [vmem:[%s3241_s2 + $0x18] sm:$0xff] %v2398_v7   ;;  %v1603_v16 = vadd.f32 %v1602_v61, %v1588_v3  ;;  %v1407_v37 = vadd.f32 %v1406_v15, %v1358_v9 }
 0x186   :  { %v1455_v13 = vpop.f32.mrf.mxu3  ;;  %v1359_v6 = vpop.f32.mrf.mxu1 }
 0x187   :  { %v1456_v19 = vadd.f32 %v1455_v13, %v1407_v37  ;;  %v1360_v26 = vadd.f32 %v1359_v6, %v3125_v8 }
 0x188   :  { %v1506_v20 = vpop.f32.mrf.mxu0 }
 0x189   :  { %v1505_v12 = vadd.f32 %v1504_v2, %v1456_v19 }
 0x18b   :  { %v1564_v10 = vadd.f32 %v1563_v14, %v1505_v12  ;;  %v1589_v24 = vmul.f32 %v1505_v12, %v1505_v12 }
 0x18c   :  { %v1408_v27 = vpop.f32.mrf.mxu2 }
 0x18d   :  { %v1604_v34 = vadd.f32 %v1603_v16, %v1589_v24  ;;  %v1409_v28 = vadd.f32 %v1408_v27, %v1360_v26 }
 0x18e   :  { %v1457_v47 = vpop.f32.mrf.mxu3  ;;  %v1362_v29 = vpop.f32.mrf.mxu1 }
 0x18f   :  { %v1458_v30 = vadd.f32 %v1457_v47, %v1409_v28  ;;  %v1363_v38 = vadd.f32 %v1362_v29, %v3134_v21 }
 0x190   :  { %v1509_v31 = vpop.f32.mrf.mxu0 }
 0x191   :  { %v1507_v32 = vadd.f32 %v1506_v20, %v1458_v30 }
 0x193   :  { %v2403_v11 = vpack.c.bf16 %v1507_v32, %v1505_v12  ;;  %v1565_v35 = vadd.f32 %v1564_v10, %v1507_v32  ;;  %v1590_v36 = vmul.f32 %v1507_v32, %v1507_v32 }
 0x194   :  { %v1411_v22 = vpop.f32.mrf.mxu2 }
 0x195   :  { %2423 = vst [vmem:[%s3241_s2 + $0x20] sm:$0xff] %v2403_v11   ;;  %v1605_v39 = vadd.f32 %v1604_v34, %v1590_v36  ;;  %v1412_v8 = vadd.f32 %v1411_v22, %v1363_v38 }
 0x196   :  { %v1460_v44 = vpop.f32.mrf.mxu3  ;;  %v1364_v41 = vpop.f32.mrf.mxu1 }
 0x197   :  { %v1461_v43 = vadd.f32 %v1460_v44, %v1412_v8  ;;  %v1365_v56 = vadd.f32 %v1364_v41, %v3155_v42 }
 0x198   :  { %v1511_v50 = vpop.f32.mrf.mxu0 }
 0x199   :  { %v1510_v23 = vadd.f32 %v1509_v31, %v1461_v43 }
 0x19b   :  { %v1566_v45 = vadd.f32 %v1565_v35, %v1510_v23  ;;  %v1591_v46 = vmul.f32 %v1510_v23, %v1510_v23 }
 0x19c   :  { %v1413_v54 = vpop.f32.mrf.mxu2 }
 0x19d   :  { %v1606_v48 = vadd.f32 %v1605_v39, %v1591_v46  ;;  %v1414_v49 = vadd.f32 %v1413_v54, %v1365_v56 }
 0x19e   :  { %v1462_v21 = vpop.f32.mrf.mxu3  ;;  %v1367_v4 = vpop.f32.mrf.mxu1 }
 0x19f   :  { %v1463_v51 = vadd.f32 %v1462_v21, %v1414_v49  ;;  %v1368_v62 = vadd.f32 %v1367_v4, %v3164_v52 }
 0x1a0   :  { %v1514_v53 = vpop.f32.mrf.mxu0 }
 0x1a1   :  { %v1512_v55 = vadd.f32 %v1511_v50, %v1463_v51 }
 0x1a3   :  { %v2408_v40 = vpack.c.bf16 %v1512_v55, %v1510_v23  ;;  %v1567_v57 = vadd.f32 %v1566_v45, %v1512_v55  ;;  %v1592_v58 = vmul.f32 %v1512_v55, %v1512_v55 }
 0x1a4   :  { %v1416_v59 = vpop.f32.mrf.mxu2 }
 0x1a5   :  { %2424 = vst [vmem:[%s3241_s2 + $0x28] sm:$0xff] %v2408_v40   ;;  %v1607_v60 = vadd.f32 %v1606_v48, %v1592_v58  ;;  %v1417_v42 = vadd.f32 %v1416_v59, %v1368_v62 }
 0x1a6   :  { %v1465_v61 = vpop.f32.mrf.mxu3  ;;  %v1369_v63 = vpop.f32.mrf.mxu1 }
 0x1a7   :  { %v1466_v18 = vadd.f32 %v1465_v61, %v1417_v42  ;;  %v1370_v5 = vadd.f32 %v1369_v63, %v3185_v17 }
 0x1a8   :  { %v1516_v7 = vpop.f32.mrf.mxu0 }
 0x1a9   :  { %v1515_v0 = vadd.f32 %v1514_v53, %v1466_v18 }
 0x1ab   :  { %v1568_v1 = vadd.f32 %v1567_v57, %v1515_v0  ;;  %v1593_v2 = vmul.f32 %v1515_v0, %v1515_v0 }
 0x1ac   :  { %v1418_v14 = vpop.f32.mrf.mxu2 }
 0x1ad   :  { %v1608_v3 = vadd.f32 %v1607_v60, %v1593_v2  ;;  %v1419_v9 = vadd.f32 %v1418_v14, %v1370_v5 }
 0x1ae   :  { %v1467_v52 = vpop.f32.mrf.mxu3  ;;  %v1372_v15 = vpop.f32.mrf.mxu1 }
 0x1af   :  { %v1468_v16 = vadd.f32 %v1467_v52, %v1419_v9  ;;  %v1373_v20 = vadd.f32 %v1372_v15, %v3188_v25 }
 0x1b0   :  { %v1519_v26 = vpop.f32.mrf.mxu0 }
 0x1b1   :  { %v1517_v37 = vadd.f32 %v1516_v7, %v1468_v16 }
 0x1b3   :  { %v2413_v13 = vpack.c.bf16 %v1517_v37, %v1515_v0  ;;  %v1569_v6 = vadd.f32 %v1568_v1, %v1517_v37  ;;  %v1594_v19 = vmul.f32 %v1517_v37, %v1517_v37 }
 0x1b4   :  { %v1421_v12 = vpop.f32.mrf.mxu2 }
 0x1b5   :  { %2425 = vst [vmem:[%s3241_s2 + $0x30] sm:$0xff] %v2413_v13   ;;  %v1609_v10 = vadd.f32 %v1608_v3, %v1594_v19  ;;  %v1422_v17 = vadd.f32 %v1421_v12, %v1373_v20 }
 0x1b6   :  { %v1470_v24 = vpop.f32.mrf.mxu3  ;;  %v1374_v34 = vpop.f32.mrf.mxu1 }
 0x1b7   :  { %v1471_v27 = vadd.f32 %v1470_v24, %v1422_v17  ;;  %v1375_v30 = vadd.f32 %v1374_v34, %v3191_v33 }
 0x1b8   :  { %v1521_v36 = vpop.f32.mrf.mxu0 }
 0x1b9   :  { %v1520_v28 = vadd.f32 %v1519_v26, %v1471_v27 }
 0x1bb   :  { %v1570_v47 = vadd.f32 %v1569_v6, %v1520_v28  ;;  %v1595_v29 = vmul.f32 %v1520_v28, %v1520_v28 }
 0x1bc   :  { %v1423_v31 = vpop.f32.mrf.mxu2 }
 0x1bd   :  { %v1610_v32 = vadd.f32 %v1609_v10, %v1595_v29  ;;  %v1424_v11 = vadd.f32 %v1423_v31, %v1375_v30 }
 0x1be   :  { %v1472_v25 = vpop.f32.mrf.mxu3 }
 0x1bf   :  { %v1473_v35 = vadd.f32 %v1472_v25, %v1424_v11 }
 0x1c1   :  { %v1522_v38 = vadd.f32 %v1521_v36, %v1473_v35 }
 0x1c3   :  { %v2418_v22 = vpack.c.bf16 %v1522_v38, %v1520_v28  ;;  %v1571_v39 = vadd.f32 %v1570_v47, %v1522_v38  ;;  %v1596_v8 = vmul.f32 %v1522_v38, %v1522_v38 }
 0x1c5   :  { %2426 = vst [vmem:[%s3241_s2 + $0x38] sm:$0xff] %v2418_v22   ;;  %v1572_v44 = vrot.slane %v1571_v39, 4  ;;  %v1611_v41 = vadd.f32 %v1610_v32, %v1596_v8 }
 0x1c7   :  { %v1573_v43 = vadd.f32 %v1572_v44, %v1571_v39  ;;  %v1612_v50 = vrot.slane %v1611_v41, 4 }
 0x1c9   :  { %v1574_v23 = vrot.slane %v1573_v43, 2  ;;  %v1613_v33 = vadd.f32 %v1612_v50, %v1611_v41 }
 0x1cb   :  { %v1575_v45 = vadd.f32 %v1574_v23, %v1573_v43  ;;  %v1614_v46 = vrot.slane %v1613_v33, 2 }
 0x1cd   :  { %v1576_v56 = vrot.slane %v1575_v45, 1  ;;  %v1615_v54 = vadd.f32 %v1614_v46, %v1613_v33 }
 0x1cf   :  { %v1577_v48 = vadd.f32 %v1576_v56, %v1575_v45  ;;  %v1616_v49 = vrot.slane %v1615_v54, 1 }
 0x1d1   :  { %v1617_v21 = vadd.f32 %v1616_v49, %v1615_v54  ;;  %1579 = vst [vmem:[%s3242_s3] sm:$0xff] %v1577_v48 }
 0x1d3   :  { %1619 = vst [vmem:[%s3243_s4] sm:$0xff] %v1617_v21 }

</bundles_post_ra>
